<compile_context>
chip_gen: v7x
topology: tpu7x:2x2x1
jax: 0.10.0
libtpu: 0.0.40
codegen_flags: <defaults>
</compile_context>

<pallas_src>
import jax
import jax.numpy as jnp
import numpy as np
from jax.experimental import pallas as pl
from jax.experimental.pallas import tpu as pltpu


def _round_up(x, m):
    return (x + m - 1) // m * m


def _lstm_kernel(x_ref, win_ref, bin_ref, whh_ref, w1_ref, b1_ref,
                 out_ref, gates_sc, hall_sc, h_sc, c_sc):
    Bp, Hp = h_sc.shape
    T = x_ref.shape[0] // Bp

    # Batched input projection for ALL timesteps (fc0 folded in, biases pre-fused).
    gates_sc[...] = (
        jnp.dot(x_ref[...], win_ref[...], preferred_element_type=jnp.float32)
        + bin_ref[...])

    h_sc[...] = jnp.zeros_like(h_sc)
    c_sc[...] = jnp.zeros_like(c_sc)

    def step(t, carry):
        row = pl.multiple_of(t * Bp, 8)
        gx = gates_sc[pl.ds(row, Bp), :]                       # (Bp, 4*Hp)
        gates = gx + jnp.dot(h_sc[...], whh_ref[...],
                             preferred_element_type=jnp.float32)
        # PyTorch gate order i, f, g, o; slices are 128-lane aligned.
        i_g = jax.nn.sigmoid(gates[:, 0 * Hp:1 * Hp])
        f_g = jax.nn.sigmoid(gates[:, 1 * Hp:2 * Hp])
        g_g = jnp.tanh(gates[:, 2 * Hp:3 * Hp])
        o_g = jax.nn.sigmoid(gates[:, 3 * Hp:4 * Hp])
        c_new = f_g * c_sc[...] + i_g * g_g
        h_new = o_g * jnp.tanh(c_new)
        c_sc[...] = c_new
        h_sc[...] = h_new
        hall_sc[pl.ds(row, Bp), :] = h_new
        return carry

    jax.lax.fori_loop(0, T, step, 0, unroll=True)

    # fc1 over all timesteps at once -> single lane-dense store.
    out_ref[...] = (jnp.dot(hall_sc[...], w1_ref[...],
                            preferred_element_type=jnp.float32) + b1_ref[...])


def custom_lstm_pallas(x, static_params, params):
    """x: (B, T, input_size), static_params: (B, n_static) -> (B, T, output_size)."""
    B, T, _ = x.shape
    w0, b0, wih, bih, whh, bhh, w1, b1 = params
    Din, H = w0.shape
    O = w1.shape[1]

    Bp = _round_up(max(B, 8), 8)      # sublane-aligned batch rows
    Hp = _round_up(H, 128)            # 128 lanes per gate
    Op = _round_up(O, 128)            # lane-dense output
    f32 = jnp.float32

    def pad_gate_cols(m):
        # (..., 4*H) -> (..., 4*Hp): each gate block padded with zeros to Hp lanes.
        m = m.astype(f32)
        m4 = m.reshape(m.shape[:-1] + (4, H))
        out = jnp.zeros(m.shape[:-1] + (4, Hp), f32).at[..., :H].set(m4)
        return out.reshape(m.shape[:-1] + (4 * Hp,))

    # Fold fc0 (no nonlinearity) into the LSTM input projection; fuse all biases.
    w_in = pad_gate_cols(w0.astype(f32) @ wih.astype(f32))               # (Din, 4*Hp)
    b_in = pad_gate_cols(
        (b0.astype(f32) @ wih.astype(f32) + bih + bhh)[None, :])         # (1, 4*Hp)

    whh_p = jnp.zeros((Hp, 4 * Hp), f32).at[:H, :].set(pad_gate_cols(whh))
    w1_p = jnp.zeros((Hp, Op), f32).at[:H, :O].set(w1.astype(f32))
    b1_p = jnp.zeros((1, Op), f32).at[0, :O].set(b1.astype(f32))

    # Glue: broadcast static predictors over time, concat, time-major, pad batch.
    s = jnp.broadcast_to(static_params[:, None, :], (B, T, static_params.shape[-1]))
    x_ds = jnp.concatenate([x, s], axis=-1).astype(f32)                  # (B, T, Din)
    x_tbd = jnp.transpose(x_ds, (1, 0, 2))                               # (T, B, Din)
    x_tbd = jnp.pad(x_tbd, ((0, 0), (0, Bp - B), (0, 0)))                # (T, Bp, Din)
    x_flat = x_tbd.reshape(T * Bp, Din)                                  # row = t*Bp + b

    vmem = pl.BlockSpec(memory_space=pltpu.MemorySpace.VMEM)

    out_flat = pl.pallas_call(
        _lstm_kernel,
        out_shape=jax.ShapeDtypeStruct((T * Bp, Op), f32),
        in_specs=[vmem] * 6,
        out_specs=vmem,
        scratch_shapes=[
            pltpu.VMEM((T * Bp, 4 * Hp), f32),   # gates_x for all timesteps
            pltpu.VMEM((T * Bp, Hp), f32),       # all hidden states
            pltpu.VMEM((Bp, Hp), f32),           # h
            pltpu.VMEM((Bp, Hp), f32),           # c
        ],
    )(x_flat, w_in, b_in, whh_p, w1_p, b1_p)

    out = out_flat.reshape(T, Bp, Op)[:, :B, :O]                         # valid region
    return jnp.transpose(out, (1, 0, 2))                                 # (B, T, O)


def custom_lstm_ref(x, static_params, params):
    """Pure-JAX reference mirroring the PyTorch forward (for validation)."""
    w0, b0, wih, bih, whh, bhh, w1, b1 = params
    B, T, _ = x.shape
    H = w0.shape[1]
    s = jnp.broadcast_to(static_params[:, None, :], (B, T, static_params.shape[-1]))
    x_ds = jnp.concatenate([x, s], axis=-1)
    l1 = x_ds @ w0 + b0                                                  # (B, T, H)

    def step(carry, xt):
        h, c = carry
        gates = xt @ wih + bih + h @ whh + bhh
        i = jax.nn.sigmoid(gates[:, 0 * H:1 * H])
        f = jax.nn.sigmoid(gates[:, 1 * H:2 * H])
        g = jnp.tanh(gates[:, 2 * H:3 * H])
        o = jax.nn.sigmoid(gates[:, 3 * H:4 * H])
        c = f * c + i * g
        h = o * jnp.tanh(c)
        return (h, c), h

    h0 = jnp.zeros((B, H), jnp.float32)
    (_, _), hs = jax.lax.scan(step, (h0, h0), jnp.transpose(l1, (1, 0, 2)))
    lstm_out = jnp.transpose(hs, (1, 0, 2))                              # (B, T, H)
    return lstm_out @ w1 + b1


def init_params(key, input_size, hidden_size, output_size, n_static):
    """Deterministic init matching the PyTorch module's parameter shapes
    (stored pre-transposed for y = x @ W)."""
    Din = input_size + n_static
    H, O = hidden_size, output_size
    ks = jax.random.split(key, 8)
    u = lambda k, shape, bound: jax.random.uniform(
        k, shape, jnp.float32, minval=-bound, maxval=bound)
    b_fc0 = 1.0 / np.sqrt(Din)
    b_lstm = 1.0 / np.sqrt(H)
    b_fc1 = 1.0 / np.sqrt(H)
    w0 = u(ks[0], (Din, H), b_fc0)           # fc0.weight^T
    b0 = u(ks[1], (H,), b_fc0)               # fc0.bias
    wih = u(ks[2], (H, 4 * H), b_lstm)       # lstm.weight_ih_l0^T
    bih = u(ks[3], (4 * H,), b_lstm)         # lstm.bias_ih_l0
    whh = u(ks[4], (H, 4 * H), b_lstm)       # lstm.weight_hh_l0^T
    bhh = u(ks[5], (4 * H,), b_lstm)         # lstm.bias_hh_l0
    w1 = u(ks[6], (H, O), b_fc1)             # fc1.weight^T
    b1 = u(ks[7], (O,), b_fc1)               # fc1.bias
    return (w0, b0, wih, bih, whh, bhh, w1, b1)


if __name__ == "__main__":
    input_size, hidden_size, output_size, n_static = 3, 34, 2, 5
    B, T = 2, 8

    key = jax.random.PRNGKey(0)
    k_x, k_s, k_p = jax.random.split(key, 3)
    x = jax.random.normal(k_x, (B, T, input_size), jnp.float32)
    static_params = jax.random.normal(k_s, (B, n_static), jnp.float32)
    params = init_params(k_p, input_size, hidden_size, output_size, n_static)

    out = custom_lstm_pallas(x, static_params, params)
    out = jax.block_until_ready(out)

    ref = jax.block_until_ready(custom_lstm_ref(x, static_params, params))
    np.testing.assert_allclose(np.asarray(out), np.asarray(ref), rtol=1e-4, atol=1e-4)

    print("KERNEL_OK")
</pallas_src>

<mosaic_0001>
module attributes {stable_mosaic.version = 11 : i64} {
  func.func @_lstm_kernel(%arg0: memref<64x8xf32, #tpu.memory_space<vmem>>, %arg1: memref<8x512xf32, #tpu.memory_space<vmem>>, %arg2: memref<1x512xf32, #tpu.memory_space<vmem>>, %arg3: memref<128x512xf32, #tpu.memory_space<vmem>>, %arg4: memref<128x128xf32, #tpu.memory_space<vmem>>, %arg5: memref<1x128xf32, #tpu.memory_space<vmem>>, %arg6: memref<64x128xf32, #tpu.memory_space<vmem>>, %arg7: memref<64x512xf32, #tpu.memory_space<vmem>>, %arg8: memref<64x128xf32, #tpu.memory_space<vmem>>, %arg9: memref<8x128xf32, #tpu.memory_space<vmem>>, %arg10: memref<8x128xf32, #tpu.memory_space<vmem>>) attributes {dimension_semantics = [], scalar_prefetch = 0 : i64, scratch_operands = 4 : i64, tpu.core_type = #tpu.core_type<tc>} {
    %c0 = arith.constant 0 : index
    %c0_0 = arith.constant 0 : index
    %0 = vector.load %arg0[%c0, %c0_0] : memref<64x8xf32, #tpu.memory_space<vmem>>, vector<64x8xf32>
    %c0_1 = arith.constant 0 : index
    %c0_2 = arith.constant 0 : index
    %1 = vector.load %arg1[%c0_1, %c0_2] : memref<8x512xf32, #tpu.memory_space<vmem>>, vector<8x512xf32>
    %cst = arith.constant dense<0.000000e+00> : vector<64x512xf32>
    %2 = tpu.matmul %0, %1, %cst {dimension_numbers = #tpu.dot_dimension_numbers<[1], [0], [0], [1], [0, 0, 1, 1], [], []>} : vector<64x8xf32>, vector<8x512xf32>, vector<64x512xf32> -> vector<64x512xf32>
    %c0_3 = arith.constant 0 : index
    %c0_4 = arith.constant 0 : index
    %3 = vector.load %arg2[%c0_3, %c0_4] : memref<1x512xf32, #tpu.memory_space<vmem>>, vector<1x512xf32>
    %4 = vector.broadcast %3 : vector<1x512xf32> to vector<64x512xf32>
    %5 = arith.addf %2, %4 : vector<64x512xf32>
    %c0_5 = arith.constant 0 : index
    %c0_6 = arith.constant 0 : index
    %6 = vector.load %arg7[%c0_5, %c0_6] : memref<64x512xf32, #tpu.memory_space<vmem>>, vector<64x512xf32>
    tpu.vector_store %arg7[%c0_5, %c0_6], %5 {strides = array<i32>} : memref<64x512xf32, #tpu.memory_space<vmem>>, vector<64x512xf32>,
    %cst_7 = arith.constant 0.000000e+00 : f32
    %7 = vector.broadcast %cst_7 : f32 to vector<8x128xf32>
    %c0_8 = arith.constant 0 : index
    %c0_9 = arith.constant 0 : index
    %8 = vector.load %arg9[%c0_8, %c0_9] : memref<8x128xf32, #tpu.memory_space<vmem>>, vector<8x128xf32>
    tpu.vector_store %arg9[%c0_8, %c0_9], %7 {strides = array<i32>} : memref<8x128xf32, #tpu.memory_space<vmem>>, vector<8x128xf32>,
    %cst_10 = arith.constant 0.000000e+00 : f32
    %9 = vector.broadcast %cst_10 : f32 to vector<8x128xf32>
    %c0_11 = arith.constant 0 : index
    %c0_12 = arith.constant 0 : index
    %10 = vector.load %arg10[%c0_11, %c0_12] : memref<8x128xf32, #tpu.memory_space<vmem>>, vector<8x128xf32>
    tpu.vector_store %arg10[%c0_11, %c0_12], %9 {strides = array<i32>} : memref<8x128xf32, #tpu.memory_space<vmem>>, vector<8x128xf32>,
    %c0_i32 = arith.constant 0 : i32
    %c8_i32 = arith.constant 8 : i32
    %11 = arith.muli %c0_i32, %c8_i32 : i32
    %12 = tpu.assume_multiple %11, 8 : i32
    %13 = arith.index_cast %12 : i32 to index
    %c0_13 = arith.constant 0 : index
    %14 = vector.load %arg7[%13, %c0_13] : memref<64x512xf32, #tpu.memory_space<vmem>>, vector<8x512xf32>
    %c0_14 = arith.constant 0 : index
    %c0_15 = arith.constant 0 : index
    %15 = vector.load %arg9[%c0_14, %c0_15] : memref<8x128xf32, #tpu.memory_space<vmem>>, vector<8x128xf32>
    %c0_16 = arith.constant 0 : index
    %c0_17 = arith.constant 0 : index
    %16 = vector.load %arg3[%c0_16, %c0_17] : memref<128x512xf32, #tpu.memory_space<vmem>>, vector<128x512xf32>
    %cst_18 = arith.constant dense<0.000000e+00> : vector<8x512xf32>
    %17 = tpu.matmul %15, %16, %cst_18 {dimension_numbers = #tpu.dot_dimension_numbers<[1], [0], [0], [1], [0, 0, 1, 1], [], []>} : vector<8x128xf32>, vector<128x512xf32>, vector<8x512xf32> -> vector<8x512xf32>
    %18 = arith.addf %14, %17 : vector<8x512xf32>
    %19 = vector.extract_strided_slice %18 {offsets = [0, 0], sizes = [8, 128], strides = [1, 1]} : vector<8x512xf32> to vector<8x128xf32>
    %20 = arith.negf %19 : vector<8x128xf32>
    %21 = math.exp %20 : vector<8x128xf32>
    %cst_19 = arith.constant 1.000000e+00 : f32
    %22 = vector.broadcast %cst_19 : f32 to vector<8x128xf32>
    %23 = arith.addf %22, %21 : vector<8x128xf32>
    %24 = arith.divf %22, %23 : vector<8x128xf32>
    %25 = vector.extract_strided_slice %18 {offsets = [0, 128], sizes = [8, 128], strides = [1, 1]} : vector<8x512xf32> to vector<8x128xf32>
    %26 = arith.negf %25 : vector<8x128xf32>
    %27 = math.exp %26 : vector<8x128xf32>
    %cst_20 = arith.constant 1.000000e+00 : f32
    %28 = vector.broadcast %cst_20 : f32 to vector<8x128xf32>
    %29 = arith.addf %28, %27 : vector<8x128xf32>
    %30 = arith.divf %28, %29 : vector<8x128xf32>
    %31 = vector.extract_strided_slice %18 {offsets = [0, 256], sizes = [8, 128], strides = [1, 1]} : vector<8x512xf32> to vector<8x128xf32>
    %32 = math.tanh %31 : vector<8x128xf32>
    %33 = vector.extract_strided_slice %18 {offsets = [0, 384], sizes = [8, 128], strides = [1, 1]} : vector<8x512xf32> to vector<8x128xf32>
    %34 = arith.negf %33 : vector<8x128xf32>
    %35 = math.exp %34 : vector<8x128xf32>
    %cst_21 = arith.constant 1.000000e+00 : f32
    %36 = vector.broadcast %cst_21 : f32 to vector<8x128xf32>
    %37 = arith.addf %36, %35 : vector<8x128xf32>
    %38 = arith.divf %36, %37 : vector<8x128xf32>
    %c0_22 = arith.constant 0 : index
    %c0_23 = arith.constant 0 : index
    %39 = vector.load %arg10[%c0_22, %c0_23] : memref<8x128xf32, #tpu.memory_space<vmem>>, vector<8x128xf32>
    %40 = arith.mulf %30, %39 : vector<8x128xf32>
    %41 = arith.mulf %24, %32 : vector<8x128xf32>
    %42 = arith.addf %40, %41 : vector<8x128xf32>
    %43 = math.tanh %42 : vector<8x128xf32>
    %44 = arith.mulf %38, %43 : vector<8x128xf32>
    %c0_24 = arith.constant 0 : index
    %c0_25 = arith.constant 0 : index
    %45 = vector.load %arg10[%c0_24, %c0_25] : memref<8x128xf32, #tpu.memory_space<vmem>>, vector<8x128xf32>
    tpu.vector_store %arg10[%c0_24, %c0_25], %42 {strides = array<i32>} : memref<8x128xf32, #tpu.memory_space<vmem>>, vector<8x128xf32>,
    %c0_26 = arith.constant 0 : index
    %c0_27 = arith.constant 0 : index
    %46 = vector.load %arg9[%c0_26, %c0_27] : memref<8x128xf32, #tpu.memory_space<vmem>>, vector<8x128xf32>
    tpu.vector_store %arg9[%c0_26, %c0_27], %44 {strides = array<i32>} : memref<8x128xf32, #tpu.memory_space<vmem>>, vector<8x128xf32>,
    %47 = arith.index_cast %12 : i32 to index
    %c0_28 = arith.constant 0 : index
    %48 = vector.load %arg8[%47, %c0_28] : memref<64x128xf32, #tpu.memory_space<vmem>>, vector<8x128xf32>
    tpu.vector_store %arg8[%47, %c0_28], %44 {strides = array<i32>} : memref<64x128xf32, #tpu.memory_space<vmem>>, vector<8x128xf32>,
    %c1_i32 = arith.constant 1 : i32
    %c8_i32_29 = arith.constant 8 : i32
    %49 = arith.muli %c1_i32, %c8_i32_29 : i32
    %50 = tpu.assume_multiple %49, 8 : i32
    %51 = arith.index_cast %50 : i32 to index
    %c0_30 = arith.constant 0 : index
    %52 = vector.load %arg7[%51, %c0_30] : memref<64x512xf32, #tpu.memory_space<vmem>>, vector<8x512xf32>
    %c0_31 = arith.constant 0 : index
    %c0_32 = arith.constant 0 : index
    %53 = vector.load %arg9[%c0_31, %c0_32] : memref<8x128xf32, #tpu.memory_space<vmem>>, vector<8x128xf32>
    %c0_33 = arith.constant 0 : index
    %c0_34 = arith.constant 0 : index
    %54 = vector.load %arg3[%c0_33, %c0_34] : memref<128x512xf32, #tpu.memory_space<vmem>>, vector<128x512xf32>
    %cst_35 = arith.constant dense<0.000000e+00> : vector<8x512xf32>
    %55 = tpu.matmul %53, %54, %cst_35 {dimension_numbers = #tpu.dot_dimension_numbers<[1], [0], [0], [1], [0, 0, 1, 1], [], []>} : vector<8x128xf32>, vector<128x512xf32>, vector<8x512xf32> -> vector<8x512xf32>
    %56 = arith.addf %52, %55 : vector<8x512xf32>
    %57 = vector.extract_strided_slice %56 {offsets = [0, 0], sizes = [8, 128], strides = [1, 1]} : vector<8x512xf32> to vector<8x128xf32>
    %58 = arith.negf %57 : vector<8x128xf32>
    %59 = math.exp %58 : vector<8x128xf32>
    %cst_36 = arith.constant 1.000000e+00 : f32
    %60 = vector.broadcast %cst_36 : f32 to vector<8x128xf32>
    %61 = arith.addf %60, %59 : vector<8x128xf32>
    %62 = arith.divf %60, %61 : vector<8x128xf32>
    %63 = vector.extract_strided_slice %56 {offsets = [0, 128], sizes = [8, 128], strides = [1, 1]} : vector<8x512xf32> to vector<8x128xf32>
    %64 = arith.negf %63 : vector<8x128xf32>
    %65 = math.exp %64 : vector<8x128xf32>
    %cst_37 = arith.constant 1.000000e+00 : f32
    %66 = vector.broadcast %cst_37 : f32 to vector<8x128xf32>
    %67 = arith.addf %66, %65 : vector<8x128xf32>
    %68 = arith.divf %66, %67 : vector<8x128xf32>
    %69 = vector.extract_strided_slice %56 {offsets = [0, 256], sizes = [8, 128], strides = [1, 1]} : vector<8x512xf32> to vector<8x128xf32>
    %70 = math.tanh %69 : vector<8x128xf32>
    %71 = vector.extract_strided_slice %56 {offsets = [0, 384], sizes = [8, 128], strides = [1, 1]} : vector<8x512xf32> to vector<8x128xf32>
    %72 = arith.negf %71 : vector<8x128xf32>
    %73 = math.exp %72 : vector<8x128xf32>
    %cst_38 = arith.constant 1.000000e+00 : f32
    %74 = vector.broadcast %cst_38 : f32 to vector<8x128xf32>
    %75 = arith.addf %74, %73 : vector<8x128xf32>
    %76 = arith.divf %74, %75 : vector<8x128xf32>
    %c0_39 = arith.constant 0 : index
    %c0_40 = arith.constant 0 : index
    %77 = vector.load %arg10[%c0_39, %c0_40] : memref<8x128xf32, #tpu.memory_space<vmem>>, vector<8x128xf32>
    %78 = arith.mulf %68, %77 : vector<8x128xf32>
    %79 = arith.mulf %62, %70 : vector<8x128xf32>
    %80 = arith.addf %78, %79 : vector<8x128xf32>
    %81 = math.tanh %80 : vector<8x128xf32>
    %82 = arith.mulf %76, %81 : vector<8x128xf32>
    %c0_41 = arith.constant 0 : index
    %c0_42 = arith.constant 0 : index
    %83 = vector.load %arg10[%c0_41, %c0_42] : memref<8x128xf32, #tpu.memory_space<vmem>>, vector<8x128xf32>
    tpu.vector_store %arg10[%c0_41, %c0_42], %80 {strides = array<i32>} : memref<8x128xf32, #tpu.memory_space<vmem>>, vector<8x128xf32>,
    %c0_43 = arith.constant 0 : index
    %c0_44 = arith.constant 0 : index
    %84 = vector.load %arg9[%c0_43, %c0_44] : memref<8x128xf32, #tpu.memory_space<vmem>>, vector<8x128xf32>
    tpu.vector_store %arg9[%c0_43, %c0_44], %82 {strides = array<i32>} : memref<8x128xf32, #tpu.memory_space<vmem>>, vector<8x128xf32>,
    %85 = arith.index_cast %50 : i32 to index
    %c0_45 = arith.constant 0 : index
    %86 = vector.load %arg8[%85, %c0_45] : memref<64x128xf32, #tpu.memory_space<vmem>>, vector<8x128xf32>
    tpu.vector_store %arg8[%85, %c0_45], %82 {strides = array<i32>} : memref<64x128xf32, #tpu.memory_space<vmem>>, vector<8x128xf32>,
    %c2_i32 = arith.constant 2 : i32
    %c8_i32_46 = arith.constant 8 : i32
    %87 = arith.muli %c2_i32, %c8_i32_46 : i32
    %88 = tpu.assume_multiple %87, 8 : i32
    %89 = arith.index_cast %88 : i32 to index
    %c0_47 = arith.constant 0 : index
    %90 = vector.load %arg7[%89, %c0_47] : memref<64x512xf32, #tpu.memory_space<vmem>>, vector<8x512xf32>
    %c0_48 = arith.constant 0 : index
    %c0_49 = arith.constant 0 : index
    %91 = vector.load %arg9[%c0_48, %c0_49] : memref<8x128xf32, #tpu.memory_space<vmem>>, vector<8x128xf32>
    %c0_50 = arith.constant 0 : index
    %c0_51 = arith.constant 0 : index
    %92 = vector.load %arg3[%c0_50, %c0_51] : memref<128x512xf32, #tpu.memory_space<vmem>>, vector<128x512xf32>
    %cst_52 = arith.constant dense<0.000000e+00> : vector<8x512xf32>
    %93 = tpu.matmul %91, %92, %cst_52 {dimension_numbers = #tpu.dot_dimension_numbers<[1], [0], [0], [1], [0, 0, 1, 1], [], []>} : vector<8x128xf32>, vector<128x512xf32>, vector<8x512xf32> -> vector<8x512xf32>
    %94 = arith.addf %90, %93 : vector<8x512xf32>
    %95 = vector.extract_strided_slice %94 {offsets = [0, 0], sizes = [8, 128], strides = [1, 1]} : vector<8x512xf32> to vector<8x128xf32>
    %96 = arith.negf %95 : vector<8x128xf32>
    %97 = math.exp %96 : vector<8x128xf32>
    %cst_53 = arith.constant 1.000000e+00 : f32
    %98 = vector.broadcast %cst_53 : f32 to vector<8x128xf32>
    %99 = arith.addf %98, %97 : vector<8x128xf32>
    %100 = arith.divf %98, %99 : vector<8x128xf32>
    %101 = vector.extract_strided_slice %94 {offsets = [0, 128], sizes = [8, 128], strides = [1, 1]} : vector<8x512xf32> to vector<8x128xf32>
    %102 = arith.negf %101 : vector<8x128xf32>
    %103 = math.exp %102 : vector<8x128xf32>
    %cst_54 = arith.constant 1.000000e+00 : f32
    %104 = vector.broadcast %cst_54 : f32 to vector<8x128xf32>
    %105 = arith.addf %104, %103 : vector<8x128xf32>
    %106 = arith.divf %104, %105 : vector<8x128xf32>
    %107 = vector.extract_strided_slice %94 {offsets = [0, 256], sizes = [8, 128], strides = [1, 1]} : vector<8x512xf32> to vector<8x128xf32>
    %108 = math.tanh %107 : vector<8x128xf32>
    %109 = vector.extract_strided_slice %94 {offsets = [0, 384], sizes = [8, 128], strides = [1, 1]} : vector<8x512xf32> to vector<8x128xf32>
    %110 = arith.negf %109 : vector<8x128xf32>
    %111 = math.exp %110 : vector<8x128xf32>
    %cst_55 = arith.constant 1.000000e+00 : f32
    %112 = vector.broadcast %cst_55 : f32 to vector<8x128xf32>
    %113 = arith.addf %112, %111 : vector<8x128xf32>
    %114 = arith.divf %112, %113 : vector<8x128xf32>
    %c0_56 = arith.constant 0 : index
    %c0_57 = arith.constant 0 : index
    %115 = vector.load %arg10[%c0_56, %c0_57] : memref<8x128xf32, #tpu.memory_space<vmem>>, vector<8x128xf32>
    %116 = arith.mulf %106, %115 : vector<8x128xf32>
    %117 = arith.mulf %100, %108 : vector<8x128xf32>
    %118 = arith.addf %116, %117 : vector<8x128xf32>
    %119 = math.tanh %118 : vector<8x128xf32>
    %120 = arith.mulf %114, %119 : vector<8x128xf32>
    %c0_58 = arith.constant 0 : index
    %c0_59 = arith.constant 0 : index
    %121 = vector.load %arg10[%c0_58, %c0_59] : memref<8x128xf32, #tpu.memory_space<vmem>>, vector<8x128xf32>
    tpu.vector_store %arg10[%c0_58, %c0_59], %118 {strides = array<i32>} : memref<8x128xf32, #tpu.memory_space<vmem>>, vector<8x128xf32>,
    %c0_60 = arith.constant 0 : index
    %c0_61 = arith.constant 0 : index
    %122 = vector.load %arg9[%c0_60, %c0_61] : memref<8x128xf32, #tpu.memory_space<vmem>>, vector<8x128xf32>
    tpu.vector_store %arg9[%c0_60, %c0_61], %120 {strides = array<i32>} : memref<8x128xf32, #tpu.memory_space<vmem>>, vector<8x128xf32>,
    %123 = arith.index_cast %88 : i32 to index
    %c0_62 = arith.constant 0 : index
    %124 = vector.load %arg8[%123, %c0_62] : memref<64x128xf32, #tpu.memory_space<vmem>>, vector<8x128xf32>
    tpu.vector_store %arg8[%123, %c0_62], %120 {strides = array<i32>} : memref<64x128xf32, #tpu.memory_space<vmem>>, vector<8x128xf32>,
    %c3_i32 = arith.constant 3 : i32
    %c8_i32_63 = arith.constant 8 : i32
    %125 = arith.muli %c3_i32, %c8_i32_63 : i32
    %126 = tpu.assume_multiple %125, 8 : i32
    %127 = arith.index_cast %126 : i32 to index
    %c0_64 = arith.constant 0 : index
    %128 = vector.load %arg7[%127, %c0_64] : memref<64x512xf32, #tpu.memory_space<vmem>>, vector<8x512xf32>
    %c0_65 = arith.constant 0 : index
    %c0_66 = arith.constant 0 : index
    %129 = vector.load %arg9[%c0_65, %c0_66] : memref<8x128xf32, #tpu.memory_space<vmem>>, vector<8x128xf32>
    %c0_67 = arith.constant 0 : index
    %c0_68 = arith.constant 0 : index
    %130 = vector.load %arg3[%c0_67, %c0_68] : memref<128x512xf32, #tpu.memory_space<vmem>>, vector<128x512xf32>
    %cst_69 = arith.constant dense<0.000000e+00> : vector<8x512xf32>
    %131 = tpu.matmul %129, %130, %cst_69 {dimension_numbers = #tpu.dot_dimension_numbers<[1], [0], [0], [1], [0, 0, 1, 1], [], []>} : vector<8x128xf32>, vector<128x512xf32>, vector<8x512xf32> -> vector<8x512xf32>
    %132 = arith.addf %128, %131 : vector<8x512xf32>
    %133 = vector.extract_strided_slice %132 {offsets = [0, 0], sizes = [8, 128], strides = [1, 1]} : vector<8x512xf32> to vector<8x128xf32>
    %134 = arith.negf %133 : vector<8x128xf32>
    %135 = math.exp %134 : vector<8x128xf32>
    %cst_70 = arith.constant 1.000000e+00 : f32
    %136 = vector.broadcast %cst_70 : f32 to vector<8x128xf32>
    %137 = arith.addf %136, %135 : vector<8x128xf32>
    %138 = arith.divf %136, %137 : vector<8x128xf32>
    %139 = vector.extract_strided_slice %132 {offsets = [0, 128], sizes = [8, 128], strides = [1, 1]} : vector<8x512xf32> to vector<8x128xf32>
    %140 = arith.negf %139 : vector<8x128xf32>
    %141 = math.exp %140 : vector<8x128xf32>
    %cst_71 = arith.constant 1.000000e+00 : f32
    %142 = vector.broadcast %cst_71 : f32 to vector<8x128xf32>
    %143 = arith.addf %142, %141 : vector<8x128xf32>
    %144 = arith.divf %142, %143 : vector<8x128xf32>
    %145 = vector.extract_strided_slice %132 {offsets = [0, 256], sizes = [8, 128], strides = [1, 1]} : vector<8x512xf32> to vector<8x128xf32>
    %146 = math.tanh %145 : vector<8x128xf32>
    %147 = vector.extract_strided_slice %132 {offsets = [0, 384], sizes = [8, 128], strides = [1, 1]} : vector<8x512xf32> to vector<8x128xf32>
    %148 = arith.negf %147 : vector<8x128xf32>
    %149 = math.exp %148 : vector<8x128xf32>
    %cst_72 = arith.constant 1.000000e+00 : f32
    %150 = vector.broadcast %cst_72 : f32 to vector<8x128xf32>
    %151 = arith.addf %150, %149 : vector<8x128xf32>
    %152 = arith.divf %150, %151 : vector<8x128xf32>
    %c0_73 = arith.constant 0 : index
    %c0_74 = arith.constant 0 : index
    %153 = vector.load %arg10[%c0_73, %c0_74] : memref<8x128xf32, #tpu.memory_space<vmem>>, vector<8x128xf32>
    %154 = arith.mulf %144, %153 : vector<8x128xf32>
    %155 = arith.mulf %138, %146 : vector<8x128xf32>
    %156 = arith.addf %154, %155 : vector<8x128xf32>
    %157 = math.tanh %156 : vector<8x128xf32>
    %158 = arith.mulf %152, %157 : vector<8x128xf32>
    %c0_75 = arith.constant 0 : index
    %c0_76 = arith.constant 0 : index
    %159 = vector.load %arg10[%c0_75, %c0_76] : memref<8x128xf32, #tpu.memory_space<vmem>>, vector<8x128xf32>
    tpu.vector_store %arg10[%c0_75, %c0_76], %156 {strides = array<i32>} : memref<8x128xf32, #tpu.memory_space<vmem>>, vector<8x128xf32>,
    %c0_77 = arith.constant 0 : index
    %c0_78 = arith.constant 0 : index
    %160 = vector.load %arg9[%c0_77, %c0_78] : memref<8x128xf32, #tpu.memory_space<vmem>>, vector<8x128xf32>
    tpu.vector_store %arg9[%c0_77, %c0_78], %158 {strides = array<i32>} : memref<8x128xf32, #tpu.memory_space<vmem>>, vector<8x128xf32>,
    %161 = arith.index_cast %126 : i32 to index
    %c0_79 = arith.constant 0 : index
    %162 = vector.load %arg8[%161, %c0_79] : memref<64x128xf32, #tpu.memory_space<vmem>>, vector<8x128xf32>
    tpu.vector_store %arg8[%161, %c0_79], %158 {strides = array<i32>} : memref<64x128xf32, #tpu.memory_space<vmem>>, vector<8x128xf32>,
    %c4_i32 = arith.constant 4 : i32
    %c8_i32_80 = arith.constant 8 : i32
    %163 = arith.muli %c4_i32, %c8_i32_80 : i32
    %164 = tpu.assume_multiple %163, 8 : i32
    %165 = arith.index_cast %164 : i32 to index
    %c0_81 = arith.constant 0 : index
    %166 = vector.load %arg7[%165, %c0_81] : memref<64x512xf32, #tpu.memory_space<vmem>>, vector<8x512xf32>
    %c0_82 = arith.constant 0 : index
    %c0_83 = arith.constant 0 : index
    %167 = vector.load %arg9[%c0_82, %c0_83] : memref<8x128xf32, #tpu.memory_space<vmem>>, vector<8x128xf32>
    %c0_84 = arith.constant 0 : index
    %c0_85 = arith.constant 0 : index
    %168 = vector.load %arg3[%c0_84, %c0_85] : memref<128x512xf32, #tpu.memory_space<vmem>>, vector<128x512xf32>
    %cst_86 = arith.constant dense<0.000000e+00> : vector<8x512xf32>
    %169 = tpu.matmul %167, %168, %cst_86 {dimension_numbers = #tpu.dot_dimension_numbers<[1], [0], [0], [1], [0, 0, 1, 1], [], []>} : vector<8x128xf32>, vector<128x512xf32>, vector<8x512xf32> -> vector<8x512xf32>
    %170 = arith.addf %166, %169 : vector<8x512xf32>
    %171 = vector.extract_strided_slice %170 {offsets = [0, 0], sizes = [8, 128], strides = [1, 1]} : vector<8x512xf32> to vector<8x128xf32>
    %172 = arith.negf %171 : vector<8x128xf32>
    %173 = math.exp %172 : vector<8x128xf32>
    %cst_87 = arith.constant 1.000000e+00 : f32
    %174 = vector.broadcast %cst_87 : f32 to vector<8x128xf32>
    %175 = arith.addf %174, %173 : vector<8x128xf32>
    %176 = arith.divf %174, %175 : vector<8x128xf32>
    %177 = vector.extract_strided_slice %170 {offsets = [0, 128], sizes = [8, 128], strides = [1, 1]} : vector<8x512xf32> to vector<8x128xf32>
    %178 = arith.negf %177 : vector<8x128xf32>
    %179 = math.exp %178 : vector<8x128xf32>
    %cst_88 = arith.constant 1.000000e+00 : f32
    %180 = vector.broadcast %cst_88 : f32 to vector<8x128xf32>
    %181 = arith.addf %180, %179 : vector<8x128xf32>
    %182 = arith.divf %180, %181 : vector<8x128xf32>
    %183 = vector.extract_strided_slice %170 {offsets = [0, 256], sizes = [8, 128], strides = [1, 1]} : vector<8x512xf32> to vector<8x128xf32>
    %184 = math.tanh %183 : vector<8x128xf32>
    %185 = vector.extract_strided_slice %170 {offsets = [0, 384], sizes = [8, 128], strides = [1, 1]} : vector<8x512xf32> to vector<8x128xf32>
    %186 = arith.negf %185 : vector<8x128xf32>
    %187 = math.exp %186 : vector<8x128xf32>
    %cst_89 = arith.constant 1.000000e+00 : f32
    %188 = vector.broadcast %cst_89 : f32 to vector<8x128xf32>
    %189 = arith.addf %188, %187 : vector<8x128xf32>
    %190 = arith.divf %188, %189 : vector<8x128xf32>
    %c0_90 = arith.constant 0 : index
    %c0_91 = arith.constant 0 : index
    %191 = vector.load %arg10[%c0_90, %c0_91] : memref<8x128xf32, #tpu.memory_space<vmem>>, vector<8x128xf32>
    %192 = arith.mulf %182, %191 : vector<8x128xf32>
    %193 = arith.mulf %176, %184 : vector<8x128xf32>
    %194 = arith.addf %192, %193 : vector<8x128xf32>
    %195 = math.tanh %194 : vector<8x128xf32>
    %196 = arith.mulf %190, %195 : vector<8x128xf32>
    %c0_92 = arith.constant 0 : index
    %c0_93 = arith.constant 0 : index
    %197 = vector.load %arg10[%c0_92, %c0_93] : memref<8x128xf32, #tpu.memory_space<vmem>>, vector<8x128xf32>
    tpu.vector_store %arg10[%c0_92, %c0_93], %194 {strides = array<i32>} : memref<8x128xf32, #tpu.memory_space<vmem>>, vector<8x128xf32>,
    %c0_94 = arith.constant 0 : index
    %c0_95 = arith.constant 0 : index
    %198 = vector.load %arg9[%c0_94, %c0_95] : memref<8x128xf32, #tpu.memory_space<vmem>>, vector<8x128xf32>
    tpu.vector_store %arg9[%c0_94, %c0_95], %196 {strides = array<i32>} : memref<8x128xf32, #tpu.memory_space<vmem>>, vector<8x128xf32>,
    %199 = arith.index_cast %164 : i32 to index
    %c0_96 = arith.constant 0 : index
    %200 = vector.load %arg8[%199, %c0_96] : memref<64x128xf32, #tpu.memory_space<vmem>>, vector<8x128xf32>
    tpu.vector_store %arg8[%199, %c0_96], %196 {strides = array<i32>} : memref<64x128xf32, #tpu.memory_space<vmem>>, vector<8x128xf32>,
    %c5_i32 = arith.constant 5 : i32
    %c8_i32_97 = arith.constant 8 : i32
    %201 = arith.muli %c5_i32, %c8_i32_97 : i32
    %202 = tpu.assume_multiple %201, 8 : i32
    %203 = arith.index_cast %202 : i32 to index
    %c0_98 = arith.constant 0 : index
    %204 = vector.load %arg7[%203, %c0_98] : memref<64x512xf32, #tpu.memory_space<vmem>>, vector<8x512xf32>
    %c0_99 = arith.constant 0 : index
    %c0_100 = arith.constant 0 : index
    %205 = vector.load %arg9[%c0_99, %c0_100] : memref<8x128xf32, #tpu.memory_space<vmem>>, vector<8x128xf32>
    %c0_101 = arith.constant 0 : index
    %c0_102 = arith.constant 0 : index
    %206 = vector.load %arg3[%c0_101, %c0_102] : memref<128x512xf32, #tpu.memory_space<vmem>>, vector<128x512xf32>
    %cst_103 = arith.constant dense<0.000000e+00> : vector<8x512xf32>
    %207 = tpu.matmul %205, %206, %cst_103 {dimension_numbers = #tpu.dot_dimension_numbers<[1], [0], [0], [1], [0, 0, 1, 1], [], []>} : vector<8x128xf32>, vector<128x512xf32>, vector<8x512xf32> -> vector<8x512xf32>
    %208 = arith.addf %204, %207 : vector<8x512xf32>
    %209 = vector.extract_strided_slice %208 {offsets = [0, 0], sizes = [8, 128], strides = [1, 1]} : vector<8x512xf32> to vector<8x128xf32>
    %210 = arith.negf %209 : vector<8x128xf32>
    %211 = math.exp %210 : vector<8x128xf32>
    %cst_104 = arith.constant 1.000000e+00 : f32
    %212 = vector.broadcast %cst_104 : f32 to vector<8x128xf32>
    %213 = arith.addf %212, %211 : vector<8x128xf32>
    %214 = arith.divf %212, %213 : vector<8x128xf32>
    %215 = vector.extract_strided_slice %208 {offsets = [0, 128], sizes = [8, 128], strides = [1, 1]} : vector<8x512xf32> to vector<8x128xf32>
    %216 = arith.negf %215 : vector<8x128xf32>
    %217 = math.exp %216 : vector<8x128xf32>
    %cst_105 = arith.constant 1.000000e+00 : f32
    %218 = vector.broadcast %cst_105 : f32 to vector<8x128xf32>
    %219 = arith.addf %218, %217 : vector<8x128xf32>
    %220 = arith.divf %218, %219 : vector<8x128xf32>
    %221 = vector.extract_strided_slice %208 {offsets = [0, 256], sizes = [8, 128], strides = [1, 1]} : vector<8x512xf32> to vector<8x128xf32>
    %222 = math.tanh %221 : vector<8x128xf32>
    %223 = vector.extract_strided_slice %208 {offsets = [0, 384], sizes = [8, 128], strides = [1, 1]} : vector<8x512xf32> to vector<8x128xf32>
    %224 = arith.negf %223 : vector<8x128xf32>
    %225 = math.exp %224 : vector<8x128xf32>
    %cst_106 = arith.constant 1.000000e+00 : f32
    %226 = vector.broadcast %cst_106 : f32 to vector<8x128xf32>
    %227 = arith.addf %226, %225 : vector<8x128xf32>
    %228 = arith.divf %226, %227 : vector<8x128xf32>
    %c0_107 = arith.constant 0 : index
    %c0_108 = arith.constant 0 : index
    %229 = vector.load %arg10[%c0_107, %c0_108] : memref<8x128xf32, #tpu.memory_space<vmem>>, vector<8x128xf32>
    %230 = arith.mulf %220, %229 : vector<8x128xf32>
    %231 = arith.mulf %214, %222 : vector<8x128xf32>
    %232 = arith.addf %230, %231 : vector<8x128xf32>
    %233 = math.tanh %232 : vector<8x128xf32>
    %234 = arith.mulf %228, %233 : vector<8x128xf32>
    %c0_109 = arith.constant 0 : index
    %c0_110 = arith.constant 0 : index
    %235 = vector.load %arg10[%c0_109, %c0_110] : memref<8x128xf32, #tpu.memory_space<vmem>>, vector<8x128xf32>
    tpu.vector_store %arg10[%c0_109, %c0_110], %232 {strides = array<i32>} : memref<8x128xf32, #tpu.memory_space<vmem>>, vector<8x128xf32>,
    %c0_111 = arith.constant 0 : index
    %c0_112 = arith.constant 0 : index
    %236 = vector.load %arg9[%c0_111, %c0_112] : memref<8x128xf32, #tpu.memory_space<vmem>>, vector<8x128xf32>
    tpu.vector_store %arg9[%c0_111, %c0_112], %234 {strides = array<i32>} : memref<8x128xf32, #tpu.memory_space<vmem>>, vector<8x128xf32>,
    %237 = arith.index_cast %202 : i32 to index
    %c0_113 = arith.constant 0 : index
    %238 = vector.load %arg8[%237, %c0_113] : memref<64x128xf32, #tpu.memory_space<vmem>>, vector<8x128xf32>
    tpu.vector_store %arg8[%237, %c0_113], %234 {strides = array<i32>} : memref<64x128xf32, #tpu.memory_space<vmem>>, vector<8x128xf32>,
    %c6_i32 = arith.constant 6 : i32
    %c8_i32_114 = arith.constant 8 : i32
    %239 = arith.muli %c6_i32, %c8_i32_114 : i32
    %240 = tpu.assume_multiple %239, 8 : i32
    %241 = arith.index_cast %240 : i32 to index
    %c0_115 = arith.constant 0 : index
    %242 = vector.load %arg7[%241, %c0_115] : memref<64x512xf32, #tpu.memory_space<vmem>>, vector<8x512xf32>
    %c0_116 = arith.constant 0 : index
    %c0_117 = arith.constant 0 : index
    %243 = vector.load %arg9[%c0_116, %c0_117] : memref<8x128xf32, #tpu.memory_space<vmem>>, vector<8x128xf32>
    %c0_118 = arith.constant 0 : index
    %c0_119 = arith.constant 0 : index
    %244 = vector.load %arg3[%c0_118, %c0_119] : memref<128x512xf32, #tpu.memory_space<vmem>>, vector<128x512xf32>
    %cst_120 = arith.constant dense<0.000000e+00> : vector<8x512xf32>
    %245 = tpu.matmul %243, %244, %cst_120 {dimension_numbers = #tpu.dot_dimension_numbers<[1], [0], [0], [1], [0, 0, 1, 1], [], []>} : vector<8x128xf32>, vector<128x512xf32>, vector<8x512xf32> -> vector<8x512xf32>
    %246 = arith.addf %242, %245 : vector<8x512xf32>
    %247 = vector.extract_strided_slice %246 {offsets = [0, 0], sizes = [8, 128], strides = [1, 1]} : vector<8x512xf32> to vector<8x128xf32>
    %248 = arith.negf %247 : vector<8x128xf32>
    %249 = math.exp %248 : vector<8x128xf32>
    %cst_121 = arith.constant 1.000000e+00 : f32
    %250 = vector.broadcast %cst_121 : f32 to vector<8x128xf32>
    %251 = arith.addf %250, %249 : vector<8x128xf32>
    %252 = arith.divf %250, %251 : vector<8x128xf32>
    %253 = vector.extract_strided_slice %246 {offsets = [0, 128], sizes = [8, 128], strides = [1, 1]} : vector<8x512xf32> to vector<8x128xf32>
    %254 = arith.negf %253 : vector<8x128xf32>
    %255 = math.exp %254 : vector<8x128xf32>
    %cst_122 = arith.constant 1.000000e+00 : f32
    %256 = vector.broadcast %cst_122 : f32 to vector<8x128xf32>
    %257 = arith.addf %256, %255 : vector<8x128xf32>
    %258 = arith.divf %256, %257 : vector<8x128xf32>
    %259 = vector.extract_strided_slice %246 {offsets = [0, 256], sizes = [8, 128], strides = [1, 1]} : vector<8x512xf32> to vector<8x128xf32>
    %260 = math.tanh %259 : vector<8x128xf32>
    %261 = vector.extract_strided_slice %246 {offsets = [0, 384], sizes = [8, 128], strides = [1, 1]} : vector<8x512xf32> to vector<8x128xf32>
    %262 = arith.negf %261 : vector<8x128xf32>
    %263 = math.exp %262 : vector<8x128xf32>
    %cst_123 = arith.constant 1.000000e+00 : f32
    %264 = vector.broadcast %cst_123 : f32 to vector<8x128xf32>
    %265 = arith.addf %264, %263 : vector<8x128xf32>
    %266 = arith.divf %264, %265 : vector<8x128xf32>
    %c0_124 = arith.constant 0 : index
    %c0_125 = arith.constant 0 : index
    %267 = vector.load %arg10[%c0_124, %c0_125] : memref<8x128xf32, #tpu.memory_space<vmem>>, vector<8x128xf32>
    %268 = arith.mulf %258, %267 : vector<8x128xf32>
    %269 = arith.mulf %252, %260 : vector<8x128xf32>
    %270 = arith.addf %268, %269 : vector<8x128xf32>
    %271 = math.tanh %270 : vector<8x128xf32>
    %272 = arith.mulf %266, %271 : vector<8x128xf32>
    %c0_126 = arith.constant 0 : index
    %c0_127 = arith.constant 0 : index
    %273 = vector.load %arg10[%c0_126, %c0_127] : memref<8x128xf32, #tpu.memory_space<vmem>>, vector<8x128xf32>
    tpu.vector_store %arg10[%c0_126, %c0_127], %270 {strides = array<i32>} : memref<8x128xf32, #tpu.memory_space<vmem>>, vector<8x128xf32>,
    %c0_128 = arith.constant 0 : index
    %c0_129 = arith.constant 0 : index
    %274 = vector.load %arg9[%c0_128, %c0_129] : memref<8x128xf32, #tpu.memory_space<vmem>>, vector<8x128xf32>
    tpu.vector_store %arg9[%c0_128, %c0_129], %272 {strides = array<i32>} : memref<8x128xf32, #tpu.memory_space<vmem>>, vector<8x128xf32>,
    %275 = arith.index_cast %240 : i32 to index
    %c0_130 = arith.constant 0 : index
    %276 = vector.load %arg8[%275, %c0_130] : memref<64x128xf32, #tpu.memory_space<vmem>>, vector<8x128xf32>
    tpu.vector_store %arg8[%275, %c0_130], %272 {strides = array<i32>} : memref<64x128xf32, #tpu.memory_space<vmem>>, vector<8x128xf32>,
    %c7_i32 = arith.constant 7 : i32
    %c8_i32_131 = arith.constant 8 : i32
    %277 = arith.muli %c7_i32, %c8_i32_131 : i32
    %278 = tpu.assume_multiple %277, 8 : i32
    %279 = arith.index_cast %278 : i32 to index
    %c0_132 = arith.constant 0 : index
    %280 = vector.load %arg7[%279, %c0_132] : memref<64x512xf32, #tpu.memory_space<vmem>>, vector<8x512xf32>
    %c0_133 = arith.constant 0 : index
    %c0_134 = arith.constant 0 : index
    %281 = vector.load %arg9[%c0_133, %c0_134] : memref<8x128xf32, #tpu.memory_space<vmem>>, vector<8x128xf32>
    %c0_135 = arith.constant 0 : index
    %c0_136 = arith.constant 0 : index
    %282 = vector.load %arg3[%c0_135, %c0_136] : memref<128x512xf32, #tpu.memory_space<vmem>>, vector<128x512xf32>
    %cst_137 = arith.constant dense<0.000000e+00> : vector<8x512xf32>
    %283 = tpu.matmul %281, %282, %cst_137 {dimension_numbers = #tpu.dot_dimension_numbers<[1], [0], [0], [1], [0, 0, 1, 1], [], []>} : vector<8x128xf32>, vector<128x512xf32>, vector<8x512xf32> -> vector<8x512xf32>
    %284 = arith.addf %280, %283 : vector<8x512xf32>
    %285 = vector.extract_strided_slice %284 {offsets = [0, 0], sizes = [8, 128], strides = [1, 1]} : vector<8x512xf32> to vector<8x128xf32>
    %286 = arith.negf %285 : vector<8x128xf32>
    %287 = math.exp %286 : vector<8x128xf32>
    %cst_138 = arith.constant 1.000000e+00 : f32
    %288 = vector.broadcast %cst_138 : f32 to vector<8x128xf32>
    %289 = arith.addf %288, %287 : vector<8x128xf32>
    %290 = arith.divf %288, %289 : vector<8x128xf32>
    %291 = vector.extract_strided_slice %284 {offsets = [0, 128], sizes = [8, 128], strides = [1, 1]} : vector<8x512xf32> to vector<8x128xf32>
    %292 = arith.negf %291 : vector<8x128xf32>
    %293 = math.exp %292 : vector<8x128xf32>
    %cst_139 = arith.constant 1.000000e+00 : f32
    %294 = vector.broadcast %cst_139 : f32 to vector<8x128xf32>
    %295 = arith.addf %294, %293 : vector<8x128xf32>
    %296 = arith.divf %294, %295 : vector<8x128xf32>
    %297 = vector.extract_strided_slice %284 {offsets = [0, 256], sizes = [8, 128], strides = [1, 1]} : vector<8x512xf32> to vector<8x128xf32>
    %298 = math.tanh %297 : vector<8x128xf32>
    %299 = vector.extract_strided_slice %284 {offsets = [0, 384], sizes = [8, 128], strides = [1, 1]} : vector<8x512xf32> to vector<8x128xf32>
    %300 = arith.negf %299 : vector<8x128xf32>
    %301 = math.exp %300 : vector<8x128xf32>
    %cst_140 = arith.constant 1.000000e+00 : f32
    %302 = vector.broadcast %cst_140 : f32 to vector<8x128xf32>
    %303 = arith.addf %302, %301 : vector<8x128xf32>
    %304 = arith.divf %302, %303 : vector<8x128xf32>
    %c0_141 = arith.constant 0 : index
    %c0_142 = arith.constant 0 : index
    %305 = vector.load %arg10[%c0_141, %c0_142] : memref<8x128xf32, #tpu.memory_space<vmem>>, vector<8x128xf32>
    %306 = arith.mulf %296, %305 : vector<8x128xf32>
    %307 = arith.mulf %290, %298 : vector<8x128xf32>
    %308 = arith.addf %306, %307 : vector<8x128xf32>
    %309 = math.tanh %308 : vector<8x128xf32>
    %310 = arith.mulf %304, %309 : vector<8x128xf32>
    %c0_143 = arith.constant 0 : index
    %c0_144 = arith.constant 0 : index
    %311 = vector.load %arg10[%c0_143, %c0_144] : memref<8x128xf32, #tpu.memory_space<vmem>>, vector<8x128xf32>
    tpu.vector_store %arg10[%c0_143, %c0_144], %308 {strides = array<i32>} : memref<8x128xf32, #tpu.memory_space<vmem>>, vector<8x128xf32>,
    %c0_145 = arith.constant 0 : index
    %c0_146 = arith.constant 0 : index
    %312 = vector.load %arg9[%c0_145, %c0_146] : memref<8x128xf32, #tpu.memory_space<vmem>>, vector<8x128xf32>
    tpu.vector_store %arg9[%c0_145, %c0_146], %310 {strides = array<i32>} : memref<8x128xf32, #tpu.memory_space<vmem>>, vector<8x128xf32>,
    %313 = arith.index_cast %278 : i32 to index
    %c0_147 = arith.constant 0 : index
    %314 = vector.load %arg8[%313, %c0_147] : memref<64x128xf32, #tpu.memory_space<vmem>>, vector<8x128xf32>
    tpu.vector_store %arg8[%313, %c0_147], %310 {strides = array<i32>} : memref<64x128xf32, #tpu.memory_space<vmem>>, vector<8x128xf32>,
    %c8_i32_148 = arith.constant 8 : i32
    %c0_149 = arith.constant 0 : index
    %c0_150 = arith.constant 0 : index
    %315 = vector.load %arg8[%c0_149, %c0_150] : memref<64x128xf32, #tpu.memory_space<vmem>>, vector<64x128xf32>
    %c0_151 = arith.constant 0 : index
    %c0_152 = arith.constant 0 : index
    %316 = vector.load %arg4[%c0_151, %c0_152] : memref<128x128xf32, #tpu.memory_space<vmem>>, vector<128x128xf32>
    %cst_153 = arith.constant dense<0.000000e+00> : vector<64x128xf32>
    %317 = tpu.matmul %315, %316, %cst_153 {dimension_numbers = #tpu.dot_dimension_numbers<[1], [0], [0], [1], [0, 0, 1, 1], [], []>} : vector<64x128xf32>, vector<128x128xf32>, vector<64x128xf32> -> vector<64x128xf32>
    %c0_154 = arith.constant 0 : index
    %c0_155 = arith.constant 0 : index
    %318 = vector.load %arg5[%c0_154, %c0_155] : memref<1x128xf32, #tpu.memory_space<vmem>>, vector<1x128xf32>
    %319 = vector.broadcast %318 : vector<1x128xf32> to vector<64x128xf32>
    %320 = arith.addf %317, %319 : vector<64x128xf32>
    %c0_156 = arith.constant 0 : index
    %c0_157 = arith.constant 0 : index
    %321 = vector.load %arg6[%c0_156, %c0_157] : memref<64x128xf32, #tpu.memory_space<vmem>>, vector<64x128xf32>
    tpu.vector_store %arg6[%c0_156, %c0_157], %320 {strides = array<i32>} : memref<64x128xf32, #tpu.memory_space<vmem>>, vector<64x128xf32>,
    return
  }
}

</mosaic_0001>

<bundles_post_ra>
// kernel: tpu_custom_call.1
= control target key start
LH: loop header
LB: loop body
LE: loop exit
PB: predicated region body
PF: predicated region fallthrough
CT: control target
= control target key end

     0   :  { %11 = vsyncpa [#allocation7], 0  ;;  %s4083_s0 = inlined_call_operand.vmem [shape: f32[64,8], index: 0, kind: input, shape index: {}]   ;;  %s4084_s1 = inlined_call_operand.vmem [shape: f32[8,512], index: 1, kind: input, shape index: {}]   ;;  %s4085_s2 = inlined_call_operand.vmem [shape: f32[1,512], index: 2, kind: input, shape index: {}]   ;;  %s4086_s3 = inlined_call_operand.hbm [shape: f32[128,512], index: 3, kind: input, shape index: {}]   ;;  %s4087_s4 = inlined_call_operand.hbm [shape: f32[128,128], index: 4, kind: input, shape index: {}]   ;;  %s4088_s5 = inlined_call_operand.vmem [shape: f32[1,128], index: 5, kind: input, shape index: {}]   ;;  %s4089_s6 = inlined_call_operand.hbm [shape: f32[64,128], index: 6, kind: output, shape index: {}]  }
   0x1   :  { %12 = vsyncpa [#allocation10], 0 }
   0x2   :  { %13 = vsyncpa [#allocation8], 0  ;;  %s3440_s21 = smov [#allocation6]   ;;  %s3368_s25 = scalar_lea.hbm %s4086_s3, 8192 }
   0x3   :  { %s25_s22 = sshll.u32 %s3440_s21, 4  ;;  %p3369_p0 = scmp.ne.s32.totalorder %s4086_s3, %s3368_s25  ;;  %s26_s22 = int_to_ptr.vmem [resolvable:$true] %s25_s22 }
   0x4   :  { %p3372_p1 = scmp.lt.u32.totalorder %s3368_s25, %s4086_s3 }
   0x6   :  { %p3374_p2 = pnand %p3372_p1, %p3369_p0 }
   0x8   :  { %3377 = shalt.err (!%p3374_p2)
}
   0x9   :  { %s3378_s30 = scalar_lea.vmem %s26_s22, 8192  ;;  %p3383_p4 = scmp.lt.s32.totalorder %s26_s22, %s26_s22 }
   0xa   :  { %p3379_p3 = scmp.ne.s32.totalorder %s26_s22, %s3378_s30  ;;  %p3384_p5 = scmp.lt.s32.totalorder %s3378_s30, %s3378_s30 }
   0xc   :  { %p3385_p6 = por %p3384_p5, %p3383_p4 }
   0xe   :  { %p3386_p7 = pnand %p3385_p6, %p3379_p3 }
  0x10   :  { %3389 = shalt.err (!%p3386_p7)
}
  0x11   :  { %s3441_s7 = smov 512   ;;  %s3442_s8 = smov 32  }
  0x12   :  { %31 = dma.hbm_to_vmem [thread:$0]  %s4086_s3, 8192, %s26_s22, [#allocation7], %s3441_s7, %s3441_s7, %s3442_s8  }
  0x13   :  { %s3443_s11 = smov [#allocation9]   ;;  %s3390_s15 = scalar_lea.hbm %s4087_s4, 2048 }
  0x14   :  { %s37_s12 = sshll.u32 %s3443_s11, 4  ;;  %p3391_p8 = scmp.ne.s32.totalorder %s4087_s4, %s3390_s15  ;;  %s38_s12 = int_to_ptr.vmem [resolvable:$true] %s37_s12 }
  0x15   :  { %p3394_p9 = scmp.lt.u32.totalorder %s3390_s15, %s4087_s4 }
  0x17   :  { %p3396_p10 = pnand %p3394_p9, %p3391_p8 }
  0x19   :  { %3399 = shalt.err (!%p3396_p10)
}
  0x1a   :  { %s3400_s20 = scalar_lea.vmem %s38_s12, 2048  ;;  %p3405_p12 = scmp.lt.s32.totalorder %s38_s12, %s38_s12 }
  0x1b   :  { %p3401_p11 = scmp.ne.s32.totalorder %s38_s12, %s3400_s20  ;;  %p3406_p13 = scmp.lt.s32.totalorder %s3400_s20, %s3400_s20 }
  0x1d   :  { %p3407_p0 = por %p3406_p13, %p3405_p12 }
  0x1f   :  { %p3408_p1 = pnand %p3407_p0, %p3401_p11 }
  0x21   :  { %3411 = shalt.err (!%p3408_p1)
}
  0x22   :  { %s3444_s3 = smov 128   ;;  %s3445_s21 = smov 8  }
  0x23   :  { %43 = dma.hbm_to_vmem [thread:$0]  %s4087_s4, 2048, %s38_s12, [#allocation10], %s3444_s3, %s3444_s3, %s3445_s21  }
  0x24   :  { %3434 = dma.done.wait [#allocation7], 8192  }
  0x25   :  { %3435 = vsyncadd [#allocation7], 4294959104 }
  0x26   :  { %3436 = dma.done.wait [#allocation10], 2048  }
  0x27   :  { %3437 = vsyncadd [#allocation10], 4294965248  ;;  %v3446_v0 = vmov 0.0   ;;  %v63_v1 = vld [vmem:[%s4084_s1 + $0x18] sm:$0xff]  ;;  %v62_v2 = vld [vmem:[%s4084_s1 + $0x10] sm:$0xff]  ;;  %vm86_vm0 = vcmask 64512  }
  0x28   :  { %288 = vmatprep.mubr.f32.mxu1 %v3446_v0  ;;  %175 = vmatprep.mubr.f32.mxu0 %v3446_v0  ;;  %v52_v3 = vld [vmem:[%s4083_s0] sm:$0xff]  ;;  %v380_v4 = vld [vmem:[#allocation6 + $0x8] sm:$0xff]  ;;  %v54_v24 = vld [vmem:[%s4083_s0 + $0x10] sm:$0xff] }
  0x29   :  { %224 = vmatprep.subr.mxu1 %v63_v1  ;;  %v384_v5 = vld [vmem:[#allocation6 + $0x28] sm:$0xff]  ;;  %v379_v6 = vld [vmem:[#allocation6] sm:$0xff]  ;;  %v55_v31 = vld [vmem:[%s4083_s0 + $0x18] sm:$0xff] }
  0x2a   :  { %225 = vmatpush1.msra.mxu1 %v62_v2  ;;  %v3521_v7 = vpack.c.bf16 %v384_v5, %v380_v4  ;;  %v383_v8 = vld [vmem:[#allocation6 + $0x20] sm:$0xff]  ;;  %v388_v9 = vld [vmem:[#allocation6 + $0x48] sm:$0xff]  ;;  %v58_v54 = vld [vmem:[%s4083_s0 + $0x30] sm:$0xff] }
  0x2b   :  { %2523 = vmatmul.mubr.msk.f32.vlgmr.msra.gmra.mrb[0].mxu1 %vm86_vm0, %v52_v3  ;;  %v3524_v10 = vpack.c.bf16 %v383_v8, %v379_v6  ;;  %v392_v11 = vld [vmem:[#allocation6 + $0x68] sm:$0xff]  ;;  %v387_v12 = vld [vmem:[#allocation6 + $0x40] sm:$0xff]  ;;  %v382_v59 = vld [vmem:[#allocation6 + $0x18] sm:$0xff] }
  0x2c   :  { %v391_v13 = vld [vmem:[#allocation6 + $0x60] sm:$0xff]  ;;  %2625 = vmatprep.subr.bf16.mxu1 %v3521_v7  ;;  %294 = vmatprep.mubr.f32.mxu1 %v3446_v0  ;;  %v53_v14 = vld [vmem:[%s4083_s0 + $0x8] sm:$0xff]  ;;  %v3531_v15 = vpack.c.bf16 %v392_v11, %v388_v9  ;;  %v386_v60 = vld [vmem:[#allocation6 + $0x38] sm:$0xff] }
  0x2d   :  { %v396_v16 = vld [vmem:[#allocation6 + $0x88] sm:$0xff]  ;;  %2627 = vmatpush1.bf16.msra.mxu1 %v3524_v10  ;;  %v3534_v18 = vpack.c.bf16 %v391_v13, %v387_v12  ;;  %v395_v20 = vld [vmem:[#allocation6 + $0x80] sm:$0xff]  ;;  %v59_v61 = vld [vmem:[%s4083_s0 + $0x38] sm:$0xff]  ;;  %v3624_v63 = vpack.c.bf16 %v386_v60, %v382_v59 }
  0x2e   :  { %v400_v17 = vld [vmem:[#allocation6 + $0xa8] sm:$0xff]  ;;  %2629 = vmatprep.subr.bf16.mxu1 %v3531_v15  ;;  %v399_v21 = vld [vmem:[#allocation6 + $0xa0] sm:$0xff]  ;;  %v381_v1 = vld [vmem:[#allocation6 + $0x10] sm:$0xff] }
  0x2f   :  { %v3537_v19 = vpack.c.bf16 %v400_v17, %v396_v16  ;;  %2524 = vmatmul.mubr.msk.f32.gmra.mrb[2].mxu1 %vm86_vm0, %v53_v14  ;;  %v404_v22 = vld [vmem:[#allocation6 + $0xc8] sm:$0xff]  ;;  %v3545_v25 = vpack.c.bf16 %v399_v21, %v395_v20  ;;  %v403_v27 = vld [vmem:[#allocation6 + $0xc0] sm:$0xff]  ;;  %v385_v2 = vld [vmem:[#allocation6 + $0x30] sm:$0xff] }
  0x30   :  { %v408_v23 = vld [vmem:[#allocation6 + $0xe8] sm:$0xff]  ;;  %300 = vmatprep.mubr.f32.mxu1 %v3446_v0  ;;  %v407_v28 = vld [vmem:[#allocation6 + $0xe0] sm:$0xff]  ;;  %v394_v4 = vld [vmem:[#allocation6 + $0x78] sm:$0xff]  ;;  %v3632_v5 = vpack.c.bf16 %v385_v2, %v381_v1  ;;  %v66_v1 = vlaneseq }
  0x31   :  { %2631 = vmatpush1.bf16.msra.mxu1 %v3534_v18  ;;  %v3548_v26 = vpack.c.bf16 %v408_v23, %v404_v22  ;;  %v412_v29 = vld [vmem:[#allocation6 + $0x108] sm:$0xff]  ;;  %v3559_v33 = vpack.c.bf16 %v407_v28, %v403_v27  ;;  %v60_v34 = vld [vmem:[%s4084_s1] sm:$0xff]  ;;  %v389_v8 = vld [vmem:[#allocation6 + $0x50] sm:$0xff] }
  0x32   :  { %2633 = vmatprep.subr.bf16.mxu1 %v3537_v19  ;;  %v416_v30 = vld [vmem:[#allocation6 + $0x128] sm:$0xff]  ;;  %v411_v36 = vld [vmem:[#allocation6 + $0x100] sm:$0xff]  ;;  %v393_v9 = vld [vmem:[#allocation6 + $0x70] sm:$0xff]  ;;  %v67_v2 = vshrl.u32 %v66_v1, 7 }
  0x33   :  { %2525 = vmatmul.mubr.msk.f32.gmra.mrb[4].mxu1 %vm86_vm0, %v54_v24  ;;  %v61_v32 = vld [vmem:[%s4084_s1 + $0x8] sm:$0xff]  ;;  %v3565_v35 = vpack.c.bf16 %v416_v30, %v412_v29  ;;  %v415_v37 = vld [vmem:[#allocation6 + $0x120] sm:$0xff]  ;;  %v398_v11 = vld [vmem:[#allocation6 + $0x98] sm:$0xff]  ;;  %v3643_v13 = vpack.c.bf16 %v393_v9, %v389_v8 }
  0x34   :  { %306 = vmatprep.mubr.f32.mxu1 %v3446_v0  ;;  %111 = vmatprep.subr.mxu0 %v61_v32  ;;  %v420_v38 = vld [vmem:[#allocation6 + $0x148] sm:$0xff]  ;;  %v56_v40 = vld [vmem:[%s4083_s0 + $0x20] sm:$0xff]  ;;  %v3575_v41 = vpack.c.bf16 %v415_v37, %v411_v36  ;;  %v402_v12 = vld [vmem:[#allocation6 + $0xb8] sm:$0xff]  ;;  %v72_v8 = vsub.s32 1, %v67_v2 }
  0x35   :  { %2635 = vmatpush1.bf16.msra.mxu1 %v3545_v25  ;;  %112 = vmatpush1.msra.mxu0 %v60_v34  ;;  %v424_v39 = vld [vmem:[#allocation6 + $0x168] sm:$0xff]  ;;  %v419_v43 = vld [vmem:[#allocation6 + $0x140] sm:$0xff]  ;;  %v397_v16 = vld [vmem:[#allocation6 + $0x90] sm:$0xff] }
  0x36   :  { %2637 = vmatprep.subr.bf16.mxu1 %v3548_v26  ;;  %2515 = vmatmul.mubr.msk.f32.vlgmr.msra.gmra.mrb[0].mxu0 %vm86_vm0, %v52_v3  ;;  %v3579_v42 = vpack.c.bf16 %v424_v39, %v420_v38  ;;  %v423_v44 = vld [vmem:[#allocation6 + $0x160] sm:$0xff]  ;;  %v428_v45 = vld [vmem:[#allocation6 + $0x188] sm:$0xff]  ;;  %v390_v3 = vld [vmem:[#allocation6 + $0x58] sm:$0xff] }
  0x37   :  { %2526 = vmatmul.mubr.msk.f32.gmra.mrb[6].mxu1 %vm86_vm0, %v55_v31  ;;  %2689 = vmatprep.subr.bf16.mxu0 %v3521_v7  ;;  %v432_v46 = vld [vmem:[#allocation6 + $0x1a8] sm:$0xff]  ;;  %v3590_v48 = vpack.c.bf16 %v423_v44, %v419_v43  ;;  %v427_v50 = vld [vmem:[#allocation6 + $0x180] sm:$0xff]  ;;  %v3636_v6 = vpack.c.bf16 %v394_v4, %v390_v3  ;;  %v401_v17 = vld [vmem:[#allocation6 + $0xb0] sm:$0xff]  ;;  %v68_v3 = vsub.s32 0, %v67_v2 }
  0x38   :  { %312 = vmatprep.mubr.f32.mxu1 %v3446_v0  ;;  %2691 = vmatpush1.bf16.msra.mxu0 %v3524_v10  ;;  %v57_v47 = vld [vmem:[%s4083_s0 + $0x28] sm:$0xff]  ;;  %v3594_v49 = vpack.c.bf16 %v432_v46, %v428_v45  ;;  %v431_v51 = vld [vmem:[#allocation6 + $0x1a0] sm:$0xff]  ;;  %v406_v20 = vld [vmem:[#allocation6 + $0xd8] sm:$0xff]  ;;  %v3654_v22 = vpack.c.bf16 %v401_v17, %v397_v16 }
  0x39   :  { %2639 = vmatpush1.bf16.msra.mxu1 %v3559_v33  ;;  %181 = vmatprep.mubr.f32.mxu0 %v3446_v0  ;;  %v436_v52 = vld [vmem:[#allocation6 + $0x1c8] sm:$0xff]  ;;  %v3605_v55 = vpack.c.bf16 %v431_v51, %v427_v50  ;;  %v435_v57 = vld [vmem:[#allocation6 + $0x1c0] sm:$0xff]  ;;  %v410_v21 = vld [vmem:[#allocation6 + $0xf8] sm:$0xff] }
  0x3a   :  { %2641 = vmatprep.subr.bf16.mxu1 %v3565_v35  ;;  %2693 = vmatprep.subr.bf16.mxu0 %v3531_v15  ;;  %v440_v53 = vld [vmem:[#allocation6 + $0x1e8] sm:$0xff]  ;;  %v439_v58 = vld [vmem:[#allocation6 + $0x1e0] sm:$0xff]  ;;  %v3658_v23 = vpack.c.bf16 %v410_v21, %v406_v20  ;;  %v409_v27 = vld [vmem:[#allocation6 + $0xf0] sm:$0xff] }
  0x3b   :  { %2527 = vmatmul.mubr.msk.f32.gmra.mrb[8].mxu1 %vm86_vm0, %v56_v40  ;;  %2516 = vmatmul.mubr.msk.f32.gmra.mrb[2].mxu0 %vm86_vm0, %v53_v14  ;;  %v3609_v56 = vpack.c.bf16 %v440_v53, %v436_v52  ;;  %v3620_v62 = vpack.c.bf16 %v439_v58, %v435_v57  ;;  %v3647_v14 = vpack.c.bf16 %v402_v12, %v398_v11  ;;  %v414_v28 = vld [vmem:[#allocation6 + $0x118] sm:$0xff]  ;;  %v413_v32 = vld [vmem:[#allocation6 + $0x110] sm:$0xff]  ;;  %v64_v4 = vld [vmem:[%s4085_s2] sm:$0xf] }
  0x3c   :  { %318 = vmatprep.mubr.f32.mxu1 %v3446_v0  ;;  %2695 = vmatpush1.bf16.msra.mxu0 %v3534_v18  ;;  %v418_v29 = vld [vmem:[#allocation6 + $0x138] sm:$0xff]  ;;  %v417_v34 = vld [vmem:[#allocation6 + $0x130] sm:$0xff]  ;;  %v3717_v9 = vrot.slane %v64_v4, %v68_v3  ;;  %v3719_v11 = vrot.slane %v64_v4, %v72_v8 }
  0x3d   :  { %2643 = vmatpush1.bf16.msra.mxu1 %v3575_v41  ;;  %187 = vmatprep.mubr.f32.mxu0 %v3446_v0  ;;  %v422_v36 = vld [vmem:[#allocation6 + $0x158] sm:$0xff]  ;;  %v3673_v38 = vpack.c.bf16 %v417_v34, %v413_v32  ;;  %v425_v43 = vld [vmem:[#allocation6 + $0x170] sm:$0xff]  ;;  %v80_v34 = vsub.s32 3, %v67_v2 }
  0x3e   :  { %2645 = vmatprep.subr.bf16.mxu1 %v3579_v42  ;;  %2697 = vmatprep.subr.bf16.mxu0 %v3537_v19  ;;  %v426_v37 = vld [vmem:[#allocation6 + $0x178] sm:$0xff]  ;;  %v433_v50 = vld [vmem:[#allocation6 + $0x1b0] sm:$0xff] }
  0x3f   :  { %2528 = vmatmul.mubr.msk.f32.gmra.mrb[10].mxu1 %vm86_vm0, %v57_v47  ;;  %2517 = vmatmul.mubr.msk.f32.gmra.mrb[4].mxu0 %vm86_vm0, %v54_v24  ;;  %v405_v24 = vld [vmem:[#allocation6 + $0xd0] sm:$0xff]  ;;  %v3676_v39 = vpack.c.bf16 %v426_v37, %v422_v36  ;;  %v430_v44 = vld [vmem:[#allocation6 + $0x198] sm:$0xff] }
  0x40   :  { %324 = vmatprep.mubr.f32.mxu1 %v3446_v0  ;;  %2699 = vmatpush1.bf16.msra.mxu0 %v3545_v25  ;;  %v3664_v30 = vpack.c.bf16 %v409_v27, %v405_v24  ;;  %v434_v45 = vld [vmem:[#allocation6 + $0x1b8] sm:$0xff]  ;;  %v437_v57 = vld [vmem:[#allocation6 + $0x1d0] sm:$0xff] }
  0x41   :  { %2647 = vmatpush1.bf16.msra.mxu1 %v3590_v48  ;;  %193 = vmatprep.mubr.f32.mxu0 %v3446_v0  ;;  %v438_v51 = vld [vmem:[#allocation6 + $0x1d8] sm:$0xff]  ;;  %v441_v58 = vld [vmem:[#allocation6 + $0x1f0] sm:$0xff] }
  0x42   :  { %2649 = vmatprep.subr.bf16.mxu1 %v3594_v49  ;;  %2701 = vmatprep.subr.bf16.mxu0 %v3548_v26  ;;  %v442_v52 = vld [vmem:[#allocation6 + $0x1f8] sm:$0xff]  ;;  %v3691_v59 = vpack.c.bf16 %v441_v58, %v437_v57 }
  0x43   :  { %2529 = vmatmul.mubr.msk.f32.gmra.mrb[12].mxu1 %vm86_vm0, %v58_v54  ;;  %2518 = vmatmul.mubr.msk.f32.gmra.mrb[6].mxu0 %vm86_vm0, %v55_v31  ;;  %v3668_v31 = vpack.c.bf16 %v418_v29, %v414_v28  ;;  %v76_v29 = vsub.s32 2, %v67_v2 }
  0x44   :  { %330 = vmatprep.mubr.f32.mxu1 %v3446_v0  ;;  %2703 = vmatpush1.bf16.msra.mxu0 %v3559_v33 }
  0x45   :  { %2651 = vmatpush1.bf16.msra.mxu1 %v3605_v55  ;;  %199 = vmatprep.mubr.f32.mxu0 %v3446_v0 }
  0x46   :  { %2653 = vmatprep.subr.bf16.mxu1 %v3609_v56  ;;  %2705 = vmatprep.subr.bf16.mxu0 %v3565_v35 }
  0x47   :  { %2530 = vmatmul.mubr.msk.f32.gmra.mrb[14].mxu1 %vm86_vm0, %v59_v61  ;;  %2519 = vmatmul.mubr.msk.f32.gmra.mrb[8].mxu0 %vm86_vm0, %v56_v40  ;;  %v421_v40 = vld [vmem:[#allocation6 + $0x150] sm:$0xff] }
  0x48   :  { %507 = vmatprep.mubr.f32.mxu1 %v3446_v0  ;;  %2707 = vmatpush1.bf16.msra.mxu0 %v3575_v41  ;;  %v3679_v46 = vpack.c.bf16 %v425_v43, %v421_v40  ;;  %v3723_v40 = vrot.slane %v64_v4, %v76_v29 }
  0x49   :  { %2655 = vmatpush1.bf16.msra.mxu1 %v3620_v62  ;;  %205 = vmatprep.mubr.f32.mxu0 %v3446_v0 }
  0x4a   :  { %2657 = vmatprep.subr.bf16.mxu1 %v3624_v63  ;;  %2709 = vmatprep.subr.bf16.mxu0 %v3579_v42 }
  0x4b   :  { %2520 = vmatmul.mubr.msk.f32.gmra.mrb[10].mxu0 %vm86_vm0, %v57_v47  ;;  %v3682_v47 = vpack.c.bf16 %v434_v45, %v430_v44  ;;  %v3725_v44 = vrot.slane %v64_v4, %v80_v34 }
  0x4c   :  { %508 = vmatmul.mubr.f32.vlgmr.msra.gmra.mrb[16].mxu1 %v3446_v0  ;;  %2711 = vmatpush1.bf16.msra.mxu0 %v3590_v48 }
  0x4d   :  { %2659 = vmatpush1.bf16.msra.mxu1 %v3632_v5  ;;  %578 = vmatprep.mubr.f32.mxu1 %v3446_v0 }
  0x4e   :  { %2661 = vmatprep.subr.bf16.mxu1 %v3636_v6  ;;  %211 = vmatprep.mubr.f32.mxu0 %v3446_v0 }
  0x4f   :  { %2713 = vmatprep.subr.bf16.mxu0 %v3594_v49  ;;  %2521 = vmatmul.mubr.msk.f32.gmra.mrb[12].mxu0 %vm86_vm0, %v58_v54  ;;  %v3688_v54 = vpack.c.bf16 %v442_v52, %v438_v51 }
  0x50   :  { %217 = vmatprep.mubr.f32.mxu0 %v3446_v0  ;;  %2715 = vmatpush1.bf16.msra.mxu0 %v3605_v55 }
  0x51   :  { %2663 = vmatpush1.bf16.msra.mxu1 %v3643_v13  ;;  %2717 = vmatprep.subr.bf16.mxu0 %v3609_v56 }
  0x52   :  { %2665 = vmatprep.subr.bf16.mxu1 %v3647_v14 }
  0x53   :  { %2522 = vmatmul.mubr.msk.f32.gmra.mrb[14].mxu0 %vm86_vm0, %v59_v61 }
  0x54   :  { %753 = vmatprep.mubr.f32.mxu0 %v3446_v0  ;;  %2719 = vmatpush1.bf16.msra.mxu0 %v3620_v62 }
  0x55   :  { %2667 = vmatpush1.bf16.msra.mxu1 %v3654_v22  ;;  %2753 = vmatprep.subr.bf16.mxu0 %v3521_v7  ;;  %v429_v7 = vld [vmem:[#allocation6 + $0x190] sm:$0xff] }
  0x56   :  { %2669 = vmatprep.subr.bf16.mxu1 %v3658_v23  ;;  %v3685_v53 = vpack.c.bf16 %v433_v50, %v429_v7 }
  0x59   :  { %2671 = vmatpush1.bf16.msra.mxu1 %v3664_v30 }
  0x5a   :  { %2673 = vmatprep.subr.bf16.mxu1 %v3668_v31 }
  0x5d   :  { %2675 = vmatpush1.bf16.msra.mxu1 %v3673_v38 }
  0x5e   :  { %2677 = vmatprep.subr.bf16.mxu1 %v3676_v39 }
  0x61   :  { %2679 = vmatpush1.bf16.msra.mxu1 %v3679_v46 }
  0x62   :  { %2681 = vmatprep.subr.bf16.mxu1 %v3682_v47 }
  0x65   :  { %2683 = vmatpush1.bf16.msra.mxu1 %v3685_v53 }
  0x66   :  { %2685 = vmatprep.subr.bf16.mxu1 %v3688_v54 }
  0x69   :  { %2687 = vmatpush1.bf16.msra.mxu1 %v3691_v59 }
  0x6a   :  { %2721 = vmatprep.subr.bf16.mxu1 %v3624_v63 }
  0x6c   :  { %579 = vmatmul.mubr.f32.vlgmr.msra.gmra.mrb[0].mxu1 %v3446_v0 }
  0x6d   :  { %2723 = vmatpush1.bf16.msra.mxu1 %v3632_v5  ;;  %824 = vmatprep.mubr.f32.mxu1 %v3446_v0 }
  0x6e   :  { %2725 = vmatprep.subr.bf16.mxu1 %v3636_v6 }
  0x71   :  { %2727 = vmatpush1.bf16.msra.mxu1 %v3643_v13 }
  0x72   :  { %2729 = vmatprep.subr.bf16.mxu1 %v3647_v14 }
  0x75   :  { %2731 = vmatpush1.bf16.msra.mxu1 %v3654_v22 }
  0x76   :  { %2733 = vmatprep.subr.bf16.mxu1 %v3658_v23 }
  0x79   :  { %2735 = vmatpush1.bf16.msra.mxu1 %v3664_v30 }
  0x7a   :  { %2737 = vmatprep.subr.bf16.mxu1 %v3668_v31 }
  0x7d   :  { %2739 = vmatpush1.bf16.msra.mxu1 %v3673_v38 }
  0x7e   :  { %2741 = vmatprep.subr.bf16.mxu1 %v3676_v39 }
  0x81   :  { %2743 = vmatpush1.bf16.msra.mxu1 %v3679_v46 }
  0x82   :  { %2745 = vmatprep.subr.bf16.mxu1 %v3682_v47 }
  0x85   :  { %2747 = vmatpush1.bf16.msra.mxu1 %v3685_v53 }
  0x86   :  { %2749 = vmatprep.subr.bf16.mxu1 %v3688_v54 }
  0x89   :  { %2751 = vmatpush1.bf16.msra.mxu1 %v3691_v59 }
  0x8a   :  { %2785 = vmatprep.subr.bf16.mxu1 %v3624_v63 }
 0x109   :  { %v177_v60 = vpop.f32.mrb[0].mxu0 }
 0x10a   :  { %v179_v61 = vpop.f32.mrb[1].mxu0  ;;  %v178_v12 = vadd.f32 %v177_v60, %v3717_v9 }
 0x10b   :  { %v180_v16 = vadd.f32 %v179_v61, %v3719_v11 }
 0x11f   :  { %v509_v17 = vpop.f32.mrb[16].mxu1 }
 0x120   :  { %v585_v20 = vadd.f32 %v509_v17, %v178_v12  ;;  %v511_v21 = vpop.f32.mrb[17].mxu1 }
 0x121   :  { %v586_v24 = vadd.f32 %v511_v21, %v180_v16 }
 0x122   :  { %v2531_v28 = vmul.f32 -1.442695, %v585_v20 }
 0x123   :  { %v2532_v27 = vmul.f32 -1.442695, %v586_v24 }
 0x125   :  { %3240 = vpow2.f32 %v2532_v27 }
 0x126   :  { %3242 = vpow2.f32 %v2531_v28 }
 0x12f   :  { %v3241_v32 = vpop.eup %3240 }
 0x130   :  { %v3243_v36 = vpop.eup %3242  ;;  %v598_v37 = vadd.f32 1.0, %v3241_v32 }
 0x131   :  { %v592_v43 = vadd.f32 1.0, %v3243_v36 }
 0x132   :  { %3244 = vrcp.f32 %v598_v37  ;;  %v1135_v37 = vld [vmem:[#allocation6 + $0x80] sm:$0xff] }
 0x133   :  { %3246 = vrcp.f32 %v592_v43  ;;  %v1139_v43 = vld [vmem:[#allocation6 + $0xa0] sm:$0xff] }
 0x13c   :  { %v3245_v57 = vpop.eup %3244 }
 0x13d   :  { %v3247_v58 = vpop.eup %3246  ;;  %v609_v61 = vmul.f32 0.0, %v3245_v57  ;;  %v1147_v57 = vld [vmem:[#allocation6 + $0xe0] sm:$0xff] }
 0x13f   :  { %v580_v45 = vpop.f32.mrb[0].mxu1 }
 0x140   :  { %v3186_v7 = vadd.f32 %v580_v45, %v3723_v40  ;;  %v582_v50 = vpop.f32.mrb[1].mxu1  ;;  %v3812_v45 = vpack.c.bf16 %v1139_v43, %v1135_v37 }
 0x141   :  { %v3187_v51 = vadd.f32 %v582_v50, %v3725_v44  ;;  %v1148_v50 = vld [vmem:[#allocation6 + $0xe8] sm:$0xff] }
 0x142   :  { %3248 = vtanh.f32 %v3186_v7  ;;  %v1144_v7 = vld [vmem:[#allocation6 + $0xc8] sm:$0xff] }
 0x143   :  { %v2533_v52 = vmul.f32 -1.442695, %v3187_v51  ;;  %v3816_v51 = vpack.c.bf16 %v1148_v50, %v1144_v7 }
 0x145   :  { %3250 = vpow2.f32 %v2533_v52  ;;  %v1143_v52 = vld [vmem:[#allocation6 + $0xc0] sm:$0xff] }
 0x14c   :  { %v3249_v60 = vpop.eup %3248 }
 0x14d   :  { %v610_v1 = vmul.f32 %v3249_v60, %v3247_v58  ;;  %v3818_v58 = vpack.c.bf16 %v1147_v57, %v1143_v52  ;;  %v1152_v60 = vld [vmem:[#allocation6 + $0x108] sm:$0xff] }
 0x14f   :  { %v3251_v2 = vpop.eup %3250  ;;  %v3729_v3 = vadd.f32 %v610_v1, %v609_v61  ;;  %v1156_v61 = vld [vmem:[#allocation6 + $0x128] sm:$0xff] }
 0x150   :  { %v605_v4 = vadd.f32 1.0, %v3251_v2  ;;  %v3822_v1 = vpack.c.bf16 %v1156_v61, %v1152_v60  ;;  %v1151_v2 = vld [vmem:[#allocation6 + $0x100] sm:$0xff] }
 0x151   :  { %3252 = vtanh.f32 %v3729_v3 }
 0x152   :  { %3254 = vrcp.f32 %v605_v4 }
 0x15b   :  { %v3253_v8 = vpop.eup %3252 }
 0x15c   :  { %v3255_v12 = vpop.eup %3254 }
 0x15d   :  { %v3732_v16 = vmul.f32 %v3255_v12, %v3253_v8  ;;  %v1160_v8 = vld [vmem:[#allocation6 + $0x148] sm:$0xff] }
 0x15e   :  { %v1164_v12 = vld [vmem:[#allocation6 + $0x168] sm:$0xff] }
 0x15f   :  { %754 = vmatmul.mubr.f32.vlgmr.msra.gmra.mrb[2].mxu0 %v3732_v16  ;;  %825 = vmatmul.mubr.f32.vlgmr.msra.gmra.mrb[2].mxu1 %v3732_v16 }
 0x160   :  { %2755 = vmatpush1.bf16.msra.mxu0 %v3524_v10  ;;  %2787 = vmatpush1.bf16.msra.mxu1 %v3632_v5 }
 0x161   :  { %2757 = vmatprep.subr.bf16.mxu0 %v3531_v15  ;;  %2789 = vmatprep.subr.bf16.mxu1 %v3636_v6 }
 0x162   :  { %1000 = vmatprep.mubr.f32.mxu0 %v3446_v0  ;;  %1071 = vmatprep.mubr.f32.mxu1 %v3446_v0 }
 0x164   :  { %2759 = vmatpush1.bf16.msra.mxu0 %v3534_v18  ;;  %2791 = vmatpush1.bf16.msra.mxu1 %v3643_v13 }
 0x165   :  { %2761 = vmatprep.subr.bf16.mxu0 %v3537_v19  ;;  %2793 = vmatprep.subr.bf16.mxu1 %v3647_v14 }
 0x168   :  { %2763 = vmatpush1.bf16.msra.mxu0 %v3545_v25  ;;  %2795 = vmatpush1.bf16.msra.mxu1 %v3654_v22 }
 0x169   :  { %2765 = vmatprep.subr.bf16.mxu0 %v3548_v26  ;;  %2797 = vmatprep.subr.bf16.mxu1 %v3658_v23 }
 0x16c   :  { %2767 = vmatpush1.bf16.msra.mxu0 %v3559_v33  ;;  %2799 = vmatpush1.bf16.msra.mxu1 %v3664_v30 }
 0x16d   :  { %2769 = vmatprep.subr.bf16.mxu0 %v3565_v35  ;;  %2801 = vmatprep.subr.bf16.mxu1 %v3668_v31 }
 0x170   :  { %2771 = vmatpush1.bf16.msra.mxu0 %v3575_v41  ;;  %2803 = vmatpush1.bf16.msra.mxu1 %v3673_v38 }
 0x171   :  { %2773 = vmatprep.subr.bf16.mxu0 %v3579_v42  ;;  %2805 = vmatprep.subr.bf16.mxu1 %v3676_v39 }
 0x174   :  { %2775 = vmatpush1.bf16.msra.mxu0 %v3590_v48  ;;  %2807 = vmatpush1.bf16.msra.mxu1 %v3679_v46 }
 0x175   :  { %2777 = vmatprep.subr.bf16.mxu0 %v3594_v49  ;;  %2809 = vmatprep.subr.bf16.mxu1 %v3682_v47 }
 0x178   :  { %2779 = vmatpush1.bf16.msra.mxu0 %v3605_v55  ;;  %2811 = vmatpush1.bf16.msra.mxu1 %v3685_v53 }
 0x179   :  { %2781 = vmatprep.subr.bf16.mxu0 %v3609_v56  ;;  %2813 = vmatprep.subr.bf16.mxu1 %v3688_v54 }
 0x17c   :  { %2783 = vmatpush1.bf16.msra.mxu0 %v3620_v62  ;;  %2815 = vmatpush1.bf16.msra.mxu1 %v3691_v59 }
 0x17d   :  { %2849 = vmatprep.subr.bf16.mxu1 %v3624_v63 }
 0x232   :  { %v755_v10 = vpop.f32.mrb[2].mxu0  ;;  %v826_v15 = vpop.f32.mrb[2].mxu1 }
 0x233   :  { %v3172_v18 = vadd.f32 %v755_v10, %v3717_v9  ;;  %v757_v19 = vpop.f32.mrb[3].mxu0  ;;  %v828_v25 = vpop.f32.mrb[3].mxu1  ;;  %v3188_v48 = vadd.f32 %v826_v15, %v3723_v40  ;;  %v1159_v10 = vld [vmem:[#allocation6 + $0x140] sm:$0xff]  ;;  %v3828_v15 = vpack.c.bf16 %v1164_v12, %v1160_v8  ;;  %v1368_v8 = vld [vmem:[#allocation6 + $0x10] sm:$0xff] }
 0x234   :  { %v3173_v26 = vadd.f32 %v757_v19, %v3719_v11  ;;  %v3189_v41 = vadd.f32 %v828_v25, %v3725_v44  ;;  %v1168_v19 = vld [vmem:[#allocation6 + $0x188] sm:$0xff]  ;;  %v1372_v12 = vld [vmem:[#allocation6 + $0x30] sm:$0xff] }
 0x235   :  { %v2534_v33 = vmul.f32 -1.442695, %v3172_v18  ;;  %v1163_v18 = vld [vmem:[#allocation6 + $0x160] sm:$0xff]  ;;  %v1172_v25 = vld [vmem:[#allocation6 + $0x1a8] sm:$0xff] }
 0x236   :  { %v2535_v35 = vmul.f32 -1.442695, %v3173_v26  ;;  %v2536_v42 = vmul.f32 -1.442695, %v3189_v41  ;;  %v3830_v26 = vpack.c.bf16 %v1163_v18, %v1159_v10  ;;  %v1171_v41 = vld [vmem:[#allocation6 + $0x1a0] sm:$0xff]  ;;  %v3879_v10 = vpack.c.bf16 %v1372_v12, %v1368_v8  ;;  %v1377_v18 = vld [vmem:[#allocation6 + $0x58] sm:$0xff] }
 0x237   :  { %3256 = vpow2.f32 %v2534_v33  ;;  %v3832_v33 = vpack.c.bf16 %v1172_v25, %v1168_v19  ;;  %v1381_v19 = vld [vmem:[#allocation6 + $0x78] sm:$0xff] }
 0x238   :  { %3258 = vpow2.f32 %v2535_v35  ;;  %v1167_v35 = vld [vmem:[#allocation6 + $0x180] sm:$0xff]  ;;  %v3883_v25 = vpack.c.bf16 %v1381_v19, %v1377_v18  ;;  %v1425_v8 = vld [vmem:[#allocation6 + $0x1d8] sm:$0xff] }
 0x239   :  { %3260 = vpow2.f32 %v2536_v42  ;;  %v1176_v42 = vld [vmem:[#allocation6 + $0x1c8] sm:$0xff]  ;;  %v1429_v12 = vld [vmem:[#allocation6 + $0x1f8] sm:$0xff] }
 0x23a   :  { %3262 = vtanh.f32 %v3188_v48  ;;  %v1180_v48 = vld [vmem:[#allocation6 + $0x1e8] sm:$0xff]  ;;  %v3918_v19 = vpack.c.bf16 %v1429_v12, %v1425_v8 }
 0x241   :  { %v3257_v49 = vpop.eup %3256 }
 0x242   :  { %v3259_v55 = vpop.eup %3258  ;;  %v838_v56 = vadd.f32 1.0, %v3257_v49  ;;  %v3836_v49 = vpack.c.bf16 %v1171_v41, %v1167_v35  ;;  %v1376_v35 = vld [vmem:[#allocation6 + $0x50] sm:$0xff] }
 0x243   :  { %v844_v62 = vadd.f32 1.0, %v3259_v55  ;;  %v3261_v63 = vpop.eup %3260  ;;  %v3839_v55 = vpack.c.bf16 %v1180_v48, %v1176_v42  ;;  %v1380_v41 = vld [vmem:[#allocation6 + $0x70] sm:$0xff]  ;;  %v1385_v48 = vld [vmem:[#allocation6 + $0x98] sm:$0xff] }
 0x244   :  { %3264 = vrcp.f32 %v838_v56  ;;  %v3263_v17 = vpop.eup %3262  ;;  %v851_v27 = vadd.f32 1.0, %v3261_v63  ;;  %v1175_v56 = vld [vmem:[#allocation6 + $0x1c0] sm:$0xff]  ;;  %v3885_v42 = vpack.c.bf16 %v1380_v41, %v1376_v35  ;;  %v1424_v35 = vld [vmem:[#allocation6 + $0x1d0] sm:$0xff] }
 0x245   :  { %3266 = vrcp.f32 %v844_v62  ;;  %v1179_v62 = vld [vmem:[#allocation6 + $0x1e0] sm:$0xff]  ;;  %v1428_v41 = vld [vmem:[#allocation6 + $0x1f0] sm:$0xff] }
 0x246   :  { %3268 = vrcp.f32 %v851_v27  ;;  %v3842_v63 = vpack.c.bf16 %v1179_v62, %v1175_v56  ;;  %v1389_v56 = vld [vmem:[#allocation6 + $0xb8] sm:$0xff] }
 0x247   :  { %v3889_v62 = vpack.c.bf16 %v1389_v56, %v1385_v48  ;;  %v3921_v48 = vpack.c.bf16 %v1428_v41, %v1424_v35 }
 0x24e   :  { %v3265_v20 = vpop.eup %3264 }
 0x24f   :  { %v3267_v21 = vpop.eup %3266  ;;  %v856_v24 = vmul.f32 %v3265_v20, %v3263_v17 }
 0x250   :  { %v855_v28 = vmul.f32 %v3267_v21, %v3729_v3  ;;  %v3269_v32 = vpop.eup %3268  ;;  %v1155_v3 = vld [vmem:[#allocation6 + $0x120] sm:$0xff] }
 0x251   :  { %v3824_v4 = vpack.c.bf16 %v1155_v3, %v1151_v2  ;;  %v1373_v2 = vld [vmem:[#allocation6 + $0x38] sm:$0xff] }
 0x252   :  { %v3774_v29 = vadd.f32 %v856_v24, %v855_v28 }
 0x254   :  { %3270 = vtanh.f32 %v3774_v29 }
 0x25e   :  { %v3271_v34 = vpop.eup %3270 }
 0x25f   :  { %v3777_v36 = vmul.f32 %v3271_v34, %v3269_v32 }
 0x261   :  { %1001 = vmatmul.mubr.f32.vlgmr.msra.gmra.mrb[4].mxu0 %v3777_v36  ;;  %1072 = vmatmul.mubr.f32.vlgmr.msra.gmra.mrb[4].mxu1 %v3777_v36 }
 0x262   :  { %2851 = vmatpush1.bf16.msra.mxu1 %v3632_v5  ;;  %1247 = vmatprep.mubr.f32.mxu0 %v3446_v0  ;;  %v1120_v5 = vld [vmem:[#allocation6 + $0x8] sm:$0xff] }
 0x263   :  { %2853 = vmatprep.subr.bf16.mxu1 %v3636_v6  ;;  %1318 = vmatprep.mubr.f32.mxu1 %v3446_v0  ;;  %v1124_v6 = vld [vmem:[#allocation6 + $0x28] sm:$0xff] }
 0x266   :  { %2855 = vmatpush1.bf16.msra.mxu1 %v3643_v13  ;;  %v3798_v13 = vpack.c.bf16 %v1124_v6, %v1120_v5 }
 0x267   :  { %2857 = vmatprep.subr.bf16.mxu1 %v3647_v14  ;;  %v1119_v14 = vld [vmem:[#allocation6] sm:$0xff] }
 0x268   :  { %2817 = vmatprep.subr.bf16.mxu0 %v3798_v13 }
 0x26a   :  { %2859 = vmatpush1.bf16.msra.mxu1 %v3654_v22  ;;  %v1123_v22 = vld [vmem:[#allocation6 + $0x20] sm:$0xff] }
 0x26b   :  { %2861 = vmatprep.subr.bf16.mxu1 %v3658_v23  ;;  %v3800_v23 = vpack.c.bf16 %v1123_v22, %v1119_v14 }
 0x26d   :  { %2819 = vmatpush1.bf16.msra.mxu0 %v3800_v23 }
 0x26e   :  { %2863 = vmatpush1.bf16.msra.mxu1 %v3664_v30  ;;  %v1128_v30 = vld [vmem:[#allocation6 + $0x48] sm:$0xff] }
 0x26f   :  { %2865 = vmatprep.subr.bf16.mxu1 %v3668_v31  ;;  %v1132_v31 = vld [vmem:[#allocation6 + $0x68] sm:$0xff] }
 0x272   :  { %2867 = vmatpush1.bf16.msra.mxu1 %v3673_v38  ;;  %v3804_v38 = vpack.c.bf16 %v1132_v31, %v1128_v30 }
 0x273   :  { %2869 = vmatprep.subr.bf16.mxu1 %v3676_v39  ;;  %v1127_v39 = vld [vmem:[#allocation6 + $0x40] sm:$0xff] }
 0x274   :  { %2821 = vmatprep.subr.bf16.mxu0 %v3804_v38 }
 0x276   :  { %2871 = vmatpush1.bf16.msra.mxu1 %v3679_v46  ;;  %v1131_v46 = vld [vmem:[#allocation6 + $0x60] sm:$0xff] }
 0x277   :  { %2873 = vmatprep.subr.bf16.mxu1 %v3682_v47  ;;  %v3806_v47 = vpack.c.bf16 %v1131_v46, %v1127_v39 }
 0x279   :  { %2823 = vmatpush1.bf16.msra.mxu0 %v3806_v47 }
 0x27a   :  { %2875 = vmatpush1.bf16.msra.mxu1 %v3685_v53  ;;  %v1136_v53 = vld [vmem:[#allocation6 + $0x88] sm:$0xff] }
 0x27b   :  { %2877 = vmatprep.subr.bf16.mxu1 %v3688_v54  ;;  %v1140_v54 = vld [vmem:[#allocation6 + $0xa8] sm:$0xff] }
 0x27e   :  { %2879 = vmatpush1.bf16.msra.mxu1 %v3691_v59  ;;  %v3810_v59 = vpack.c.bf16 %v1140_v54, %v1136_v53 }
 0x280   :  { %2825 = vmatprep.subr.bf16.mxu0 %v3810_v59 }
 0x281   :  { %2827 = vmatpush1.bf16.msra.mxu0 %v3812_v45 }
 0x282   :  { %2829 = vmatprep.subr.bf16.mxu0 %v3816_v51 }
 0x285   :  { %2831 = vmatpush1.bf16.msra.mxu0 %v3818_v58 }
 0x286   :  { %2833 = vmatprep.subr.bf16.mxu0 %v3822_v1 }
 0x289   :  { %2835 = vmatpush1.bf16.msra.mxu0 %v3824_v4 }
 0x28a   :  { %2837 = vmatprep.subr.bf16.mxu0 %v3828_v15 }
 0x28d   :  { %2839 = vmatpush1.bf16.msra.mxu0 %v3830_v26 }
 0x28e   :  { %2841 = vmatprep.subr.bf16.mxu0 %v3832_v33 }
 0x291   :  { %2843 = vmatpush1.bf16.msra.mxu0 %v3836_v49 }
 0x292   :  { %2845 = vmatprep.subr.bf16.mxu0 %v3839_v55 }
 0x295   :  { %2847 = vmatpush1.bf16.msra.mxu0 %v3842_v63 }
 0x296   :  { %2881 = vmatprep.subr.bf16.mxu0 %v3798_v13 }
 0x334   :  { %v1002_v17 = vpop.f32.mrb[4].mxu0  ;;  %v1073_v20 = vpop.f32.mrb[4].mxu1 }
 0x335   :  { %v3174_v21 = vadd.f32 %v1002_v17, %v3717_v9  ;;  %v1004_v24 = vpop.f32.mrb[5].mxu0  ;;  %v1075_v27 = vpop.f32.mrb[5].mxu1  ;;  %v3190_v14 = vadd.f32 %v1073_v20, %v3723_v40  ;;  %v1384_v17 = vld [vmem:[#allocation6 + $0x90] sm:$0xff] }
 0x336   :  { %v3175_v28 = vadd.f32 %v1004_v24, %v3719_v11  ;;  %v3191_v5 = vadd.f32 %v1075_v27, %v3725_v44  ;;  %v1388_v20 = vld [vmem:[#allocation6 + $0xb0] sm:$0xff]  ;;  %v1393_v24 = vld [vmem:[#allocation6 + $0xd8] sm:$0xff] }
 0x337   :  { %v2537_v32 = vmul.f32 -1.442695, %v3174_v21  ;;  %v3891_v21 = vpack.c.bf16 %v1388_v20, %v1384_v17  ;;  %v1397_v27 = vld [vmem:[#allocation6 + $0xf8] sm:$0xff] }
 0x338   :  { %v2538_v34 = vmul.f32 -1.442695, %v3175_v28  ;;  %v2539_v6 = vmul.f32 -1.442695, %v3191_v5  ;;  %v3895_v28 = vpack.c.bf16 %v1397_v27, %v1393_v24 }
 0x339   :  { %3272 = vpow2.f32 %v2537_v32  ;;  %v1392_v32 = vld [vmem:[#allocation6 + $0xd0] sm:$0xff] }
 0x33a   :  { %3274 = vpow2.f32 %v2538_v34  ;;  %v1396_v34 = vld [vmem:[#allocation6 + $0xf0] sm:$0xff] }
 0x33b   :  { %3276 = vpow2.f32 %v2539_v6  ;;  %v3897_v5 = vpack.c.bf16 %v1396_v34, %v1392_v32  ;;  %v1401_v6 = vld [vmem:[#allocation6 + $0x118] sm:$0xff] }
 0x33c   :  { %3278 = vtanh.f32 %v3190_v14  ;;  %v1405_v14 = vld [vmem:[#allocation6 + $0x138] sm:$0xff] }
 0x343   :  { %v3273_v22 = vpop.eup %3272 }
 0x344   :  { %v3275_v30 = vpop.eup %3274  ;;  %v1085_v31 = vadd.f32 1.0, %v3273_v22  ;;  %v3901_v22 = vpack.c.bf16 %v1405_v14, %v1401_v6 }
 0x345   :  { %v1091_v39 = vadd.f32 1.0, %v3275_v30  ;;  %v3277_v46 = vpop.eup %3276  ;;  %v1400_v30 = vld [vmem:[#allocation6 + $0x110] sm:$0xff] }
 0x346   :  { %3280 = vrcp.f32 %v1085_v31  ;;  %v3279_v53 = vpop.eup %3278  ;;  %v1098_v7 = vadd.f32 1.0, %v3277_v46  ;;  %v1404_v31 = vld [vmem:[#allocation6 + $0x130] sm:$0xff]  ;;  %v1409_v46 = vld [vmem:[#allocation6 + $0x158] sm:$0xff] }
 0x347   :  { %3282 = vrcp.f32 %v1091_v39  ;;  %v3903_v39 = vpack.c.bf16 %v1404_v31, %v1400_v30 }
 0x348   :  { %3284 = vrcp.f32 %v1098_v7  ;;  %v1417_v7 = vld [vmem:[#allocation6 + $0x198] sm:$0xff] }
 0x350   :  { %v3281_v54 = vpop.eup %3280 }
 0x351   :  { %v3283_v37 = vpop.eup %3282  ;;  %v1103_v43 = vmul.f32 %v3281_v54, %v3279_v53  ;;  %v1413_v53 = vld [vmem:[#allocation6 + $0x178] sm:$0xff]  ;;  %v1408_v54 = vld [vmem:[#allocation6 + $0x150] sm:$0xff] }
 0x352   :  { %v1102_v50 = vmul.f32 %v3283_v37, %v3774_v29  ;;  %v3285_v57 = vpop.eup %3284  ;;  %v1369_v29 = vld [vmem:[#allocation6 + $0x18] sm:$0xff]  ;;  %v3907_v37 = vpack.c.bf16 %v1413_v53, %v1409_v46 }
 0x353   :  { %v3877_v3 = vpack.c.bf16 %v1373_v2, %v1369_v29  ;;  %v1416_v29 = vld [vmem:[#allocation6 + $0x190] sm:$0xff] }
 0x354   :  { %v3852_v52 = vadd.f32 %v1103_v43, %v1102_v50  ;;  %v1412_v43 = vld [vmem:[#allocation6 + $0x170] sm:$0xff]  ;;  %v1421_v50 = vld [vmem:[#allocation6 + $0x1b8] sm:$0xff] }
 0x355   :  { %2913 = vmatprep.subr.bf16.mxu1 %v3877_v3  ;;  %v1420_v2 = vld [vmem:[#allocation6 + $0x1b0] sm:$0xff] }
 0x356   :  { %3286 = vtanh.f32 %v3852_v52  ;;  %v3915_v18 = vpack.c.bf16 %v1420_v2, %v1416_v29 }
 0x360   :  { %v3287_v60 = vpop.eup %3286 }
 0x361   :  { %v3855_v61 = vmul.f32 %v3287_v60, %v3285_v57  ;;  %v3909_v57 = vpack.c.bf16 %v1412_v43, %v1408_v54  ;;  %v3911_v60 = vpack.c.bf16 %v1421_v50, %v1417_v7 }
 0x363   :  { %1248 = vmatmul.mubr.f32.vlgmr.msra.gmra.mrb[6].mxu0 %v3855_v61  ;;  %1319 = vmatmul.mubr.f32.vlgmr.msra.gmra.mrb[6].mxu1 %v3855_v61 }
 0x364   :  { %2883 = vmatpush1.bf16.msra.mxu0 %v3800_v23  ;;  %1494 = vmatprep.mubr.f32.mxu0 %v3446_v0 }
 0x365   :  { %2885 = vmatprep.subr.bf16.mxu0 %v3804_v38  ;;  %1565 = vmatprep.mubr.f32.mxu1 %v3446_v0 }
 0x366   :  { %2915 = vmatpush1.bf16.msra.mxu1 %v3879_v10 }
 0x367   :  { %2917 = vmatprep.subr.bf16.mxu1 %v3883_v25 }
 0x368   :  { %2887 = vmatpush1.bf16.msra.mxu0 %v3806_v47 }
 0x369   :  { %2889 = vmatprep.subr.bf16.mxu0 %v3810_v59 }
 0x36a   :  { %2919 = vmatpush1.bf16.msra.mxu1 %v3885_v42 }
 0x36b   :  { %2921 = vmatprep.subr.bf16.mxu1 %v3889_v62 }
 0x36c   :  { %2891 = vmatpush1.bf16.msra.mxu0 %v3812_v45 }
 0x36d   :  { %2893 = vmatprep.subr.bf16.mxu0 %v3816_v51 }
 0x36e   :  { %2923 = vmatpush1.bf16.msra.mxu1 %v3891_v21 }
 0x36f   :  { %2925 = vmatprep.subr.bf16.mxu1 %v3895_v28 }
 0x370   :  { %2895 = vmatpush1.bf16.msra.mxu0 %v3818_v58 }
 0x371   :  { %2897 = vmatprep.subr.bf16.mxu0 %v3822_v1 }
 0x372   :  { %2927 = vmatpush1.bf16.msra.mxu1 %v3897_v5 }
 0x373   :  { %2929 = vmatprep.subr.bf16.mxu1 %v3901_v22 }
 0x374   :  { %2899 = vmatpush1.bf16.msra.mxu0 %v3824_v4 }
 0x375   :  { %2901 = vmatprep.subr.bf16.mxu0 %v3828_v15 }
 0x376   :  { %2931 = vmatpush1.bf16.msra.mxu1 %v3903_v39 }
 0x377   :  { %2933 = vmatprep.subr.bf16.mxu1 %v3907_v37 }
 0x378   :  { %2903 = vmatpush1.bf16.msra.mxu0 %v3830_v26 }
 0x379   :  { %2905 = vmatprep.subr.bf16.mxu0 %v3832_v33 }
 0x37a   :  { %2935 = vmatpush1.bf16.msra.mxu1 %v3909_v57 }
 0x37b   :  { %2937 = vmatprep.subr.bf16.mxu1 %v3911_v60 }
 0x37c   :  { %2907 = vmatpush1.bf16.msra.mxu0 %v3836_v49 }
 0x37d   :  { %2909 = vmatprep.subr.bf16.mxu0 %v3839_v55 }
 0x37e   :  { %2939 = vmatpush1.bf16.msra.mxu1 %v3915_v18 }
 0x37f   :  { %2941 = vmatprep.subr.bf16.mxu1 %v3918_v19 }
 0x380   :  { %2911 = vmatpush1.bf16.msra.mxu0 %v3842_v63 }
 0x381   :  { %2945 = vmatprep.subr.bf16.mxu0 %v3798_v13 }
 0x382   :  { %2943 = vmatpush1.bf16.msra.mxu1 %v3921_v48 }
 0x383   :  { %2977 = vmatprep.subr.bf16.mxu1 %v3877_v3 }
 0x436   :  { %v1249_v56 = vpop.f32.mrb[6].mxu0  ;;  %v1320_v17 = vpop.f32.mrb[6].mxu1 }
 0x437   :  { %v3176_v20 = vadd.f32 %v1249_v56, %v3717_v9  ;;  %v1251_v24 = vpop.f32.mrb[7].mxu0  ;;  %v1322_v27 = vpop.f32.mrb[7].mxu1  ;;  %v3192_v31 = vadd.f32 %v1320_v17, %v3723_v40 }
 0x438   :  { %v3177_v32 = vadd.f32 %v1251_v24, %v3719_v11  ;;  %v3193_v14 = vadd.f32 %v1322_v27, %v3725_v44 }
 0x439   :  { %v2540_v34 = vmul.f32 -1.442695, %v3176_v20 }
 0x43a   :  { %v2541_v6 = vmul.f32 -1.442695, %v3177_v32  ;;  %v2542_v30 = vmul.f32 -1.442695, %v3193_v14 }
 0x43b   :  { %3288 = vpow2.f32 %v2540_v34 }
 0x43c   :  { %3290 = vpow2.f32 %v2541_v6 }
 0x43d   :  { %3292 = vpow2.f32 %v2542_v30 }
 0x43e   :  { %3294 = vtanh.f32 %v3192_v31 }
 0x445   :  { %v3289_v46 = vpop.eup %3288 }
 0x446   :  { %v3291_v53 = vpop.eup %3290  ;;  %v1332_v54 = vadd.f32 1.0, %v3289_v46 }
 0x447   :  { %v1338_v43 = vadd.f32 1.0, %v3291_v53  ;;  %v3293_v7 = vpop.eup %3292 }
 0x448   :  { %3296 = vrcp.f32 %v1332_v54  ;;  %v3295_v50 = vpop.eup %3294  ;;  %v1345_v12 = vadd.f32 1.0, %v3293_v7 }
 0x449   :  { %3298 = vrcp.f32 %v1338_v43 }
 0x44a   :  { %3300 = vrcp.f32 %v1345_v12 }
 0x452   :  { %v3297_v29 = vpop.eup %3296 }
 0x453   :  { %v3299_v2 = vpop.eup %3298  ;;  %v1350_v8 = vmul.f32 %v3297_v29, %v3295_v50 }
 0x454   :  { %v1349_v35 = vmul.f32 %v3299_v2, %v3852_v52  ;;  %v3301_v56 = vpop.eup %3300 }
 0x456   :  { %v3931_v41 = vadd.f32 %v1350_v8, %v1349_v35 }
 0x458   :  { %3302 = vtanh.f32 %v3931_v41 }
 0x462   :  { %v3303_v17 = vpop.eup %3302 }
 0x463   :  { %v3934_v20 = vmul.f32 %v3303_v17, %v3301_v56 }
 0x465   :  { %1495 = vmatmul.mubr.f32.vlgmr.msra.gmra.mrb[8].mxu0 %v3934_v20  ;;  %1566 = vmatmul.mubr.f32.vlgmr.msra.gmra.mrb[8].mxu1 %v3934_v20 }
 0x466   :  { %2947 = vmatpush1.bf16.msra.mxu0 %v3800_v23  ;;  %2979 = vmatpush1.bf16.msra.mxu1 %v3879_v10 }
 0x467   :  { %2949 = vmatprep.subr.bf16.mxu0 %v3804_v38  ;;  %2981 = vmatprep.subr.bf16.mxu1 %v3883_v25 }
 0x468   :  { %1741 = vmatprep.mubr.f32.mxu0 %v3446_v0  ;;  %1812 = vmatprep.mubr.f32.mxu1 %v3446_v0 }
 0x46a   :  { %2951 = vmatpush1.bf16.msra.mxu0 %v3806_v47  ;;  %2983 = vmatpush1.bf16.msra.mxu1 %v3885_v42 }
 0x46b   :  { %2953 = vmatprep.subr.bf16.mxu0 %v3810_v59  ;;  %2985 = vmatprep.subr.bf16.mxu1 %v3889_v62 }
 0x46e   :  { %2955 = vmatpush1.bf16.msra.mxu0 %v3812_v45  ;;  %2987 = vmatpush1.bf16.msra.mxu1 %v3891_v21 }
 0x46f   :  { %2957 = vmatprep.subr.bf16.mxu0 %v3816_v51  ;;  %2989 = vmatprep.subr.bf16.mxu1 %v3895_v28 }
 0x472   :  { %2959 = vmatpush1.bf16.msra.mxu0 %v3818_v58  ;;  %2991 = vmatpush1.bf16.msra.mxu1 %v3897_v5 }
 0x473   :  { %2961 = vmatprep.subr.bf16.mxu0 %v3822_v1  ;;  %2993 = vmatprep.subr.bf16.mxu1 %v3901_v22 }
 0x476   :  { %2963 = vmatpush1.bf16.msra.mxu0 %v3824_v4  ;;  %2995 = vmatpush1.bf16.msra.mxu1 %v3903_v39 }
 0x477   :  { %2965 = vmatprep.subr.bf16.mxu0 %v3828_v15  ;;  %2997 = vmatprep.subr.bf16.mxu1 %v3907_v37 }
 0x47a   :  { %2967 = vmatpush1.bf16.msra.mxu0 %v3830_v26  ;;  %2999 = vmatpush1.bf16.msra.mxu1 %v3909_v57 }
 0x47b   :  { %2969 = vmatprep.subr.bf16.mxu0 %v3832_v33  ;;  %3001 = vmatprep.subr.bf16.mxu1 %v3911_v60 }
 0x47e   :  { %2971 = vmatpush1.bf16.msra.mxu0 %v3836_v49  ;;  %3003 = vmatpush1.bf16.msra.mxu1 %v3915_v18 }
 0x47f   :  { %2973 = vmatprep.subr.bf16.mxu0 %v3839_v55  ;;  %3005 = vmatprep.subr.bf16.mxu1 %v3918_v19 }
 0x482   :  { %2975 = vmatpush1.bf16.msra.mxu0 %v3842_v63  ;;  %3007 = vmatpush1.bf16.msra.mxu1 %v3921_v48 }
 0x483   :  { %3009 = vmatprep.subr.bf16.mxu0 %v3798_v13  ;;  %3041 = vmatprep.subr.bf16.mxu1 %v3877_v3 }
 0x538   :  { %v1496_v52 = vpop.f32.mrb[8].mxu0  ;;  %v1567_v24 = vpop.f32.mrb[8].mxu1 }
 0x539   :  { %v3178_v27 = vadd.f32 %v1496_v52, %v3717_v9  ;;  %v1498_v32 = vpop.f32.mrb[9].mxu0  ;;  %v1569_v34 = vpop.f32.mrb[9].mxu1  ;;  %v3194_v53 = vadd.f32 %v1567_v24, %v3723_v40 }
 0x53a   :  { %v3179_v6 = vadd.f32 %v1498_v32, %v3719_v11  ;;  %v3195_v31 = vadd.f32 %v1569_v34, %v3725_v44 }
 0x53b   :  { %v2543_v14 = vmul.f32 -1.442695, %v3178_v27 }
 0x53c   :  { %v2544_v30 = vmul.f32 -1.442695, %v3179_v6  ;;  %v2545_v46 = vmul.f32 -1.442695, %v3195_v31 }
 0x53d   :  { %3304 = vpow2.f32 %v2543_v14 }
 0x53e   :  { %3306 = vpow2.f32 %v2544_v30 }
 0x53f   :  { %3308 = vpow2.f32 %v2545_v46 }
 0x540   :  { %3310 = vtanh.f32 %v3194_v53 }
 0x547   :  { %v3305_v13 = vpop.eup %3304 }
 0x548   :  { %v3307_v54 = vpop.eup %3306  ;;  %v1579_v43 = vadd.f32 1.0, %v3305_v13 }
 0x549   :  { %v1585_v7 = vadd.f32 1.0, %v3307_v54  ;;  %v3309_v50 = vpop.eup %3308  ;;  %v2127_v54 = vld [vmem:[#allocation6 + $0xa0] sm:$0xff] }
 0x54a   :  { %3312 = vrcp.f32 %v1579_v43  ;;  %v3311_v29 = vpop.eup %3310  ;;  %v1592_v35 = vadd.f32 1.0, %v3309_v50  ;;  %v2136_v50 = vld [vmem:[#allocation6 + $0xe8] sm:$0xff] }
 0x54b   :  { %3314 = vrcp.f32 %v1585_v7  ;;  %v2132_v7 = vld [vmem:[#allocation6 + $0xc8] sm:$0xff] }
 0x54c   :  { %3316 = vrcp.f32 %v1592_v35  ;;  %v2140_v35 = vld [vmem:[#allocation6 + $0x108] sm:$0xff] }
 0x554   :  { %v3313_v2 = vpop.eup %3312 }
 0x555   :  { %v3315_v8 = vpop.eup %3314  ;;  %v1597_v12 = vmul.f32 %v3313_v2, %v3311_v29  ;;  %v3084_v29 = vpack.c.bf16 %v2136_v50, %v2132_v7  ;;  %v2131_v2 = vld [vmem:[#allocation6 + $0xc0] sm:$0xff] }
 0x556   :  { %v1596_v56 = vmul.f32 %v3315_v8, %v3931_v41  ;;  %v3317_v52 = vpop.eup %3316  ;;  %v2135_v8 = vld [vmem:[#allocation6 + $0xe0] sm:$0xff] }
 0x558   :  { %v3977_v17 = vadd.f32 %v1597_v12, %v1596_v56  ;;  %v3086_v12 = vpack.c.bf16 %v2135_v8, %v2131_v2  ;;  %v2144_v56 = vld [vmem:[#allocation6 + $0x128] sm:$0xff]  ;;  %v2356_v2 = vld [vmem:[#allocation9 + $0x10] sm:$0xff]  ;;  %v2357_v8 = vld [vmem:[#allocation9 + $0x18] sm:$0xff] }
 0x55a   :  { %3318 = vtanh.f32 %v3977_v17 }
 0x564   :  { %v3319_v24 = vpop.eup %3318 }
 0x565   :  { %v3980_v27 = vmul.f32 %v3319_v24, %v3317_v52  ;;  %v2139_v52 = vld [vmem:[#allocation6 + $0x100] sm:$0xff] }
 0x566   :  { %v2143_v24 = vld [vmem:[#allocation6 + $0x120] sm:$0xff] }
 0x567   :  { %1742 = vmatmul.mubr.f32.vlgmr.msra.gmra.mrb[10].mxu0 %v3980_v27  ;;  %1813 = vmatmul.mubr.f32.vlgmr.msra.gmra.mrb[10].mxu1 %v3980_v27 }
 0x568   :  { %3011 = vmatpush1.bf16.msra.mxu0 %v3800_v23  ;;  %3043 = vmatpush1.bf16.msra.mxu1 %v3879_v10 }
 0x569   :  { %3013 = vmatprep.subr.bf16.mxu0 %v3804_v38  ;;  %3045 = vmatprep.subr.bf16.mxu1 %v3883_v25 }
 0x56a   :  { %1988 = vmatprep.mubr.f32.mxu0 %v3446_v0  ;;  %2059 = vmatprep.mubr.f32.mxu1 %v3446_v0 }
 0x56c   :  { %3015 = vmatpush1.bf16.msra.mxu0 %v3806_v47  ;;  %3047 = vmatpush1.bf16.msra.mxu1 %v3885_v42 }
 0x56d   :  { %3017 = vmatprep.subr.bf16.mxu0 %v3810_v59  ;;  %3049 = vmatprep.subr.bf16.mxu1 %v3889_v62 }
 0x570   :  { %3019 = vmatpush1.bf16.msra.mxu0 %v3812_v45  ;;  %3051 = vmatpush1.bf16.msra.mxu1 %v3891_v21 }
 0x571   :  { %3021 = vmatprep.subr.bf16.mxu0 %v3816_v51  ;;  %3053 = vmatprep.subr.bf16.mxu1 %v3895_v28 }
 0x574   :  { %3023 = vmatpush1.bf16.msra.mxu0 %v3818_v58  ;;  %3055 = vmatpush1.bf16.msra.mxu1 %v3897_v5 }
 0x575   :  { %3025 = vmatprep.subr.bf16.mxu0 %v3822_v1  ;;  %3057 = vmatprep.subr.bf16.mxu1 %v3901_v22 }
 0x578   :  { %3027 = vmatpush1.bf16.msra.mxu0 %v3824_v4  ;;  %3059 = vmatpush1.bf16.msra.mxu1 %v3903_v39 }
 0x579   :  { %3029 = vmatprep.subr.bf16.mxu0 %v3828_v15  ;;  %3061 = vmatprep.subr.bf16.mxu1 %v3907_v37 }
 0x57c   :  { %3031 = vmatpush1.bf16.msra.mxu0 %v3830_v26  ;;  %3063 = vmatpush1.bf16.msra.mxu1 %v3909_v57 }
 0x57d   :  { %3033 = vmatprep.subr.bf16.mxu0 %v3832_v33  ;;  %3065 = vmatprep.subr.bf16.mxu1 %v3911_v60 }
 0x580   :  { %3035 = vmatpush1.bf16.msra.mxu0 %v3836_v49  ;;  %3067 = vmatpush1.bf16.msra.mxu1 %v3915_v18 }
 0x581   :  { %3037 = vmatprep.subr.bf16.mxu0 %v3839_v55  ;;  %3069 = vmatprep.subr.bf16.mxu1 %v3918_v19 }
 0x584   :  { %3039 = vmatpush1.bf16.msra.mxu0 %v3842_v63  ;;  %3071 = vmatpush1.bf16.msra.mxu1 %v3921_v48 }
 0x585   :  { %3105 = vmatprep.subr.bf16.mxu1 %v3877_v3 }
 0x63a   :  { %v1743_v23 = vpop.f32.mrb[10].mxu0  ;;  %v1814_v38 = vpop.f32.mrb[10].mxu1 }
 0x63b   :  { %v3180_v47 = vadd.f32 %v1743_v23, %v3717_v9  ;;  %v1745_v59 = vpop.f32.mrb[11].mxu0  ;;  %v1816_v45 = vpop.f32.mrb[11].mxu1  ;;  %v3196_v26 = vadd.f32 %v1814_v38, %v3723_v40  ;;  %v3090_v23 = vpack.c.bf16 %v2143_v24, %v2139_v52  ;;  %v2148_v38 = vld [vmem:[#allocation6 + $0x148] sm:$0xff]  ;;  %v2358_v52 = vld [vmem:[#allocation9 + $0x20] sm:$0xff] }
 0x63c   :  { %v3181_v51 = vadd.f32 %v1745_v59, %v3719_v11  ;;  %v3197_v4 = vadd.f32 %v1816_v45, %v3725_v44  ;;  %v2147_v59 = vld [vmem:[#allocation6 + $0x140] sm:$0xff]  ;;  %v2359_v24 = vld [vmem:[#allocation9 + $0x28] sm:$0xff] }
 0x63d   :  { %v2546_v58 = vmul.f32 -1.442695, %v3180_v47  ;;  %v2152_v47 = vld [vmem:[#allocation6 + $0x168] sm:$0xff] }
 0x63e   :  { %v2547_v1 = vmul.f32 -1.442695, %v3181_v51  ;;  %v2548_v15 = vmul.f32 -1.442695, %v3197_v4  ;;  %v3092_v45 = vpack.c.bf16 %v2152_v47, %v2148_v38  ;;  %v2151_v51 = vld [vmem:[#allocation6 + $0x160] sm:$0xff]  ;;  %v2361_v38 = vld [vmem:[#allocation9 + $0x38] sm:$0xff] }
 0x63f   :  { %3320 = vpow2.f32 %v2546_v58  ;;  %v2156_v58 = vld [vmem:[#allocation6 + $0x188] sm:$0xff]  ;;  %v3094_v4 = vpack.c.bf16 %v2151_v51, %v2147_v59  ;;  %v2362_v59 = vld [vmem:[#allocation9 + $0x40] sm:$0xff] }
 0x640   :  { %3322 = vpow2.f32 %v2547_v1  ;;  %v2160_v1 = vld [vmem:[#allocation6 + $0x1a8] sm:$0xff] }
 0x641   :  { %3324 = vpow2.f32 %v2548_v15  ;;  %v3096_v15 = vpack.c.bf16 %v2160_v1, %v2156_v58  ;;  %v2364_v58 = vld [vmem:[#allocation9 + $0x50] sm:$0xff]  ;;  %v2365_v1 = vld [vmem:[#allocation9 + $0x58] sm:$0xff] }
 0x642   :  { %3326 = vtanh.f32 %v3196_v26  ;;  %v2155_v26 = vld [vmem:[#allocation6 + $0x180] sm:$0xff] }
 0x649   :  { %v3321_v33 = vpop.eup %3320 }
 0x64a   :  { %v3323_v49 = vpop.eup %3322  ;;  %v1826_v55 = vadd.f32 1.0, %v3321_v33  ;;  %v2159_v33 = vld [vmem:[#allocation6 + $0x1a0] sm:$0xff] }
 0x64b   :  { %v1832_v63 = vadd.f32 1.0, %v3323_v49  ;;  %v3325_v3 = vpop.eup %3324  ;;  %v2164_v49 = vld [vmem:[#allocation6 + $0x1c8] sm:$0xff] }
 0x64c   :  { %3328 = vrcp.f32 %v1826_v55  ;;  %v3327_v41 = vpop.eup %3326  ;;  %v1839_v14 = vadd.f32 1.0, %v3325_v3  ;;  %v2168_v55 = vld [vmem:[#allocation6 + $0x1e8] sm:$0xff] }
 0x64d   :  { %3330 = vrcp.f32 %v1832_v63  ;;  %v3098_v63 = vpack.c.bf16 %v2159_v33, %v2155_v26  ;;  %v3100_v3 = vpack.c.bf16 %v2168_v55, %v2164_v49  ;;  %v2367_v26 = vld [vmem:[#allocation9 + $0x68] sm:$0xff]  ;;  %v2368_v33 = vld [vmem:[#allocation9 + $0x70] sm:$0xff]  ;;  %v2369_v49 = vld [vmem:[#allocation9 + $0x78] sm:$0xff] }
 0x64e   :  { %3332 = vrcp.f32 %v1839_v14  ;;  %v3164_v55 = vpack.c.bf16 %v2369_v49, %v2368_v33 }
 0x656   :  { %v3329_v32 = vpop.eup %3328 }
 0x657   :  { %v3331_v34 = vpop.eup %3330  ;;  %v1844_v6 = vmul.f32 %v3329_v32, %v3327_v41  ;;  %v2163_v41 = vld [vmem:[#allocation6 + $0x1c0] sm:$0xff] }
 0x658   :  { %v1843_v30 = vmul.f32 %v3331_v34, %v3977_v17  ;;  %v3333_v46 = vpop.eup %3332  ;;  %v3088_v17 = vpack.c.bf16 %v2144_v56, %v2140_v35  ;;  %v2167_v32 = vld [vmem:[#allocation6 + $0x1e0] sm:$0xff] }
 0x659   :  { %v2354_v34 = vld [vmem:[#allocation9] sm:$0xff]  ;;  %v3102_v14 = vpack.c.bf16 %v2167_v32, %v2163_v41 }
 0x65a   :  { %v4022_v31 = vadd.f32 %v1844_v6, %v1843_v30  ;;  %v2355_v6 = vld [vmem:[#allocation9 + $0x8] sm:$0xff] }
 0x65b   :  { %v3136_v30 = vpack.c.bf16 %v2355_v6, %v2354_v34 }
 0x65c   :  { %3334 = vtanh.f32 %v4022_v31 }
 0x666   :  { %v3335_v53 = vpop.eup %3334 }
 0x667   :  { %v4025_v13 = vmul.f32 %v3335_v53, %v3333_v46 }
 0x669   :  { %1989 = vmatmul.mubr.f32.vlgmr.msra.gmra.mrb[12].mxu0 %v4025_v13  ;;  %2060 = vmatmul.mubr.f32.vlgmr.msra.gmra.mrb[12].mxu1 %v4025_v13 }
 0x66a   :  { %3107 = vmatpush1.bf16.msra.mxu1 %v3879_v10  ;;  %2235 = vmatprep.mubr.f32.mxu0 %v3446_v0  ;;  %v2112_v10 = vld [vmem:[#allocation6 + $0x28] sm:$0xff] }
 0x66b   :  { %3109 = vmatprep.subr.bf16.mxu1 %v3883_v25  ;;  %2306 = vmatprep.mubr.f32.mxu1 %v3446_v0  ;;  %v2108_v0 = vld [vmem:[#allocation6 + $0x8] sm:$0xff] }
 0x66c   :  { %v3072_v25 = vpack.c.bf16 %v2112_v10, %v2108_v0 }
 0x66e   :  { %3111 = vmatpush1.bf16.msra.mxu1 %v3885_v42  ;;  %v2107_v42 = vld [vmem:[#allocation6] sm:$0xff]  ;;  %3073 = vmatprep.subr.bf16.mxu0 %v3072_v25 }
 0x66f   :  { %3113 = vmatprep.subr.bf16.mxu1 %v3889_v62  ;;  %v2111_v62 = vld [vmem:[#allocation6 + $0x20] sm:$0xff] }
 0x672   :  { %3115 = vmatpush1.bf16.msra.mxu1 %v3891_v21  ;;  %v3074_v21 = vpack.c.bf16 %v2111_v62, %v2107_v42 }
 0x673   :  { %3117 = vmatprep.subr.bf16.mxu1 %v3895_v28  ;;  %v2116_v28 = vld [vmem:[#allocation6 + $0x48] sm:$0xff] }
 0x674   :  { %3075 = vmatpush1.bf16.msra.mxu0 %v3074_v21 }
 0x676   :  { %3119 = vmatpush1.bf16.msra.mxu1 %v3897_v5  ;;  %v2120_v5 = vld [vmem:[#allocation6 + $0x68] sm:$0xff] }
 0x677   :  { %3121 = vmatprep.subr.bf16.mxu1 %v3901_v22  ;;  %v3076_v22 = vpack.c.bf16 %v2120_v5, %v2116_v28 }
 0x679   :  { %3077 = vmatprep.subr.bf16.mxu0 %v3076_v22 }
 0x67a   :  { %3123 = vmatpush1.bf16.msra.mxu1 %v3903_v39  ;;  %v2115_v39 = vld [vmem:[#allocation6 + $0x40] sm:$0xff] }
 0x67b   :  { %3125 = vmatprep.subr.bf16.mxu1 %v3907_v37  ;;  %v2119_v37 = vld [vmem:[#allocation6 + $0x60] sm:$0xff] }
 0x67e   :  { %3127 = vmatpush1.bf16.msra.mxu1 %v3909_v57  ;;  %v3078_v57 = vpack.c.bf16 %v2119_v37, %v2115_v39 }
 0x67f   :  { %3129 = vmatprep.subr.bf16.mxu1 %v3911_v60  ;;  %v2124_v60 = vld [vmem:[#allocation6 + $0x88] sm:$0xff] }
 0x680   :  { %3079 = vmatpush1.bf16.msra.mxu0 %v3078_v57 }
 0x682   :  { %3131 = vmatpush1.bf16.msra.mxu1 %v3915_v18  ;;  %v2128_v18 = vld [vmem:[#allocation6 + $0xa8] sm:$0xff] }
 0x683   :  { %3133 = vmatprep.subr.bf16.mxu1 %v3918_v19  ;;  %v3080_v19 = vpack.c.bf16 %v2128_v18, %v2124_v60 }
 0x685   :  { %3081 = vmatprep.subr.bf16.mxu0 %v3080_v19 }
 0x686   :  { %3135 = vmatpush1.bf16.msra.mxu1 %v3921_v48  ;;  %v2123_v48 = vld [vmem:[#allocation6 + $0x80] sm:$0xff] }
 0x687   :  { %v3082_v43 = vpack.c.bf16 %v2127_v54, %v2123_v48 }
 0x689   :  { %3083 = vmatpush1.bf16.msra.mxu0 %v3082_v43 }
 0x68a   :  { %3085 = vmatprep.subr.bf16.mxu0 %v3084_v29 }
 0x68d   :  { %3087 = vmatpush1.bf16.msra.mxu0 %v3086_v12 }
 0x68e   :  { %3089 = vmatprep.subr.bf16.mxu0 %v3088_v17  ;;  %v3140_v17 = vpack.c.bf16 %v2357_v8, %v2356_v2 }
 0x691   :  { %3091 = vmatpush1.bf16.msra.mxu0 %v3090_v23  ;;  %v2360_v23 = vld [vmem:[#allocation9 + $0x30] sm:$0xff] }
 0x692   :  { %3093 = vmatprep.subr.bf16.mxu0 %v3092_v45  ;;  %v3148_v47 = vpack.c.bf16 %v2361_v38, %v2360_v23  ;;  %v2363_v45 = vld [vmem:[#allocation9 + $0x48] sm:$0xff] }
 0x693   :  { %v3152_v51 = vpack.c.bf16 %v2363_v45, %v2362_v59 }
 0x695   :  { %3095 = vmatpush1.bf16.msra.mxu0 %v3094_v4  ;;  %v3156_v4 = vpack.c.bf16 %v2365_v1, %v2364_v58 }
 0x696   :  { %3097 = vmatprep.subr.bf16.mxu0 %v3096_v15  ;;  %v2366_v15 = vld [vmem:[#allocation9 + $0x60] sm:$0xff] }
 0x699   :  { %3099 = vmatpush1.bf16.msra.mxu0 %v3098_v63 }
 0x69a   :  { %3101 = vmatprep.subr.bf16.mxu0 %v3100_v3 }
 0x69d   :  { %3103 = vmatpush1.bf16.msra.mxu0 %v3102_v14 }
 0x69e   :  { %3137 = vmatprep.subr.bf16.mxu0 %v3136_v30 }
 0x73c   :  { %v1990_v46 = vpop.f32.mrb[12].mxu0  ;;  %v2061_v53 = vpop.f32.mrb[12].mxu1 }
 0x73d   :  { %v3182_v0 = vadd.f32 %v1990_v46, %v3717_v9  ;;  %v1992_v10 = vpop.f32.mrb[13].mxu0  ;;  %v2063_v25 = vpop.f32.mrb[13].mxu1  ;;  %v3198_v22 = vadd.f32 %v2061_v53, %v3723_v40 }
 0x73e   :  { %v3183_v42 = vadd.f32 %v1992_v10, %v3719_v11  ;;  %v3199_v28 = vadd.f32 %v2063_v25, %v3725_v44 }
 0x73f   :  { %v2549_v62 = vmul.f32 -1.442695, %v3182_v0 }
 0x740   :  { %v2550_v21 = vmul.f32 -1.442695, %v3183_v42  ;;  %v2551_v5 = vmul.f32 -1.442695, %v3199_v28 }
 0x741   :  { %3336 = vpow2.f32 %v2549_v62 }
 0x742   :  { %3338 = vpow2.f32 %v2550_v21 }
 0x743   :  { %3340 = vpow2.f32 %v2551_v5 }
 0x744   :  { %3342 = vtanh.f32 %v3198_v22 }
 0x74b   :  { %v3337_v39 = vpop.eup %3336 }
 0x74c   :  { %v3339_v37 = vpop.eup %3338  ;;  %v2073_v57 = vadd.f32 1.0, %v3337_v39 }
 0x74d   :  { %v2079_v60 = vadd.f32 1.0, %v3339_v37  ;;  %v3341_v18 = vpop.eup %3340 }
 0x74e   :  { %3344 = vrcp.f32 %v2073_v57  ;;  %v3343_v19 = vpop.eup %3342  ;;  %v2086_v7 = vadd.f32 1.0, %v3341_v18 }
 0x74f   :  { %3346 = vrcp.f32 %v2079_v60 }
 0x750   :  { %3348 = vrcp.f32 %v2086_v7 }
 0x758   :  { %v3345_v48 = vpop.eup %3344 }
 0x759   :  { %v3347_v54 = vpop.eup %3346  ;;  %v2091_v43 = vmul.f32 %v3345_v48, %v3343_v19 }
 0x75a   :  { %v2090_v50 = vmul.f32 %v3347_v54, %v4022_v31  ;;  %v3349_v12 = vpop.eup %3348  ;;  %v3144_v31 = vpack.c.bf16 %v2359_v24, %v2358_v52 }
 0x75c   :  { %v4051_v29 = vadd.f32 %v2091_v43, %v2090_v50 }
 0x75e   :  { %3350 = vtanh.f32 %v4051_v29 }
 0x768   :  { %v3351_v35 = vpop.eup %3350 }
 0x769   :  { %v2094_v56 = vmul.f32 %v3351_v35, %v3349_v12 }
 0x76b   :  { %2236 = vmatmul.mubr.f32.vlgmr.msra.gmra.mrb[14].mxu0 %v2094_v56  ;;  %2307 = vmatmul.mubr.f32.vlgmr.msra.gmra.mrb[14].mxu1 %v2094_v56 }
 0x76c   :  { %3139 = vmatpush3.bf16.msra.mxu0 %v3136_v30  ;;  %2612 = vmatprep.mubr.f32.mxu0 %v3732_v16  ;;  %v3160_v16 = vpack.c.bf16 %v2367_v26, %v2366_v15 }
 0x76d   :  { %3141 = vmatprep.subr.bf16.mxu0 %v3140_v17 }
 0x770   :  { %3143 = vmatpush3.bf16.msra.mxu0 %v3140_v17 }
 0x771   :  { %3145 = vmatprep.subr.bf16.mxu0 %v3144_v31 }
 0x774   :  { %3147 = vmatpush3.bf16.msra.mxu0 %v3144_v31 }
 0x775   :  { %3149 = vmatprep.subr.bf16.mxu0 %v3148_v47 }
 0x778   :  { %3151 = vmatpush3.bf16.msra.mxu0 %v3148_v47 }
 0x779   :  { %3153 = vmatprep.subr.bf16.mxu0 %v3152_v51 }
 0x77c   :  { %3155 = vmatpush3.bf16.msra.mxu0 %v3152_v51 }
 0x77d   :  { %3157 = vmatprep.subr.bf16.mxu0 %v3156_v4 }
 0x780   :  { %3159 = vmatpush3.bf16.msra.mxu0 %v3156_v4 }
 0x781   :  { %3161 = vmatprep.subr.bf16.mxu0 %v3160_v16 }
 0x784   :  { %3163 = vmatpush3.bf16.msra.mxu0 %v3160_v16 }
 0x785   :  { %3165 = vmatprep.subr.bf16.mxu0 %v3164_v55 }
 0x788   :  { %3167 = vmatpush3.bf16.msra.mxu0 %v3164_v55 }
 0x78b   :  { %2613 = vmatmul.mubr.f32.vlgmr.msra.gmra.mrb[16].mxu0 %v3777_v36 }
 0x78c   :  { %2615 = vmatprep.mubr.f32.mxu0 %v3855_v61 }
 0x78f   :  { %2616 = vmatmul.mubr.f32.gmra.mrb[18].mxu0 %v3934_v20 }
 0x790   :  { %2618 = vmatprep.mubr.f32.mxu0 %v3980_v27 }
 0x793   :  { %2619 = vmatmul.mubr.f32.gmra.mrb[20].mxu0 %v4025_v13 }
 0x794   :  { %2621 = vmatprep.mubr.f32.mxu0 %v2094_v56 }
 0x83e   :  { %v2237_v63 = vpop.f32.mrb[14].mxu0  ;;  %v2308_v3 = vpop.f32.mrb[14].mxu1 }
 0x83f   :  { %v3184_v41 = vadd.f32 %v2237_v63, %v3717_v9  ;;  %v2239_v32 = vpop.f32.mrb[15].mxu0  ;;  %v2310_v34 = vpop.f32.mrb[15].mxu1  ;;  %v3200_v20 = vadd.f32 %v2308_v3, %v3723_v40  ;;  %v2555_v40 = vld [vmem:[%s4088_s5] ss:$0 sm:$0xff]  ;;  %s3447_s5 = smov [#allocation11]  }
 0x840   :  { %v3185_v6 = vadd.f32 %v2239_v32, %v3719_v11  ;;  %v3201_v36 = vadd.f32 %v2310_v34, %v3725_v44  ;;  %s2495_s25 = sshll.u32 %s3447_s5, 4  ;;  %s2496_s25 = int_to_ptr.vmem [resolvable:$true] %s2495_s25 }
 0x841   :  { %v2552_v14 = vmul.f32 -1.442695, %v3184_v41  ;;  %s3412_s26 = scalar_lea.vmem %s2496_s25, 1024  ;;  %p3417_p3 = scmp.lt.s32.totalorder %s2496_s25, %s2496_s25 }
 0x842   :  { %v2553_v30 = vmul.f32 -1.442695, %v3185_v6  ;;  %v2554_v61 = vmul.f32 -1.442695, %v3201_v36  ;;  %p3413_p2 = scmp.ne.s32.totalorder %s2496_s25, %s3412_s26  ;;  %p3418_p4 = scmp.lt.s32.totalorder %s3412_s26, %s3412_s26 }
 0x843   :  { %3352 = vpow2.f32 %v2552_v14 }
 0x844   :  { %3354 = vpow2.f32 %v2553_v30  ;;  %p3419_p5 = por %p3418_p4, %p3417_p3 }
 0x845   :  { %3356 = vpow2.f32 %v2554_v61 }
 0x846   :  { %3358 = vtanh.f32 %v3200_v20  ;;  %p3420_p6 = pnand %p3419_p5, %p3413_p2 }
 0x84d   :  { %v3353_v27 = vpop.eup %3352 }
 0x84e   :  { %v3355_v13 = vpop.eup %3354  ;;  %v2320_v46 = vadd.f32 1.0, %v3353_v27 }
 0x84f   :  { %v2326_v53 = vadd.f32 1.0, %v3355_v13  ;;  %v3357_v9 = vpop.eup %3356 }
 0x850   :  { %3360 = vrcp.f32 %v2320_v46  ;;  %v3359_v0 = vpop.eup %3358  ;;  %v2333_v42 = vadd.f32 1.0, %v3357_v9 }
 0x851   :  { %3362 = vrcp.f32 %v2326_v53 }
 0x852   :  { %3364 = vrcp.f32 %v2333_v42 }
 0x85a   :  { %v3361_v11 = vpop.eup %3360 }
 0x85b   :  { %v3363_v10 = vpop.eup %3362  ;;  %v2338_v25 = vmul.f32 %v3361_v11, %v3359_v0 }
 0x85c   :  { %v2337_v62 = vmul.f32 %v3363_v10, %v4051_v29  ;;  %v3365_v43 = vpop.eup %3364 }
 0x85e   :  { %v2614_v44 = vpop.f32.mrb[16].mxu0  ;;  %v2339_v21 = vadd.f32 %v2338_v25, %v2337_v62 }
 0x85f   :  { %v2449_v28 = vadd.f32 %v2614_v44, %v2555_v40  ;;  %v2443_v5 = vpop.f32.mrb[17].mxu0 }
 0x860   :  { %v2444_v22 = vadd.f32 %v2555_v40, %v2443_v5  ;;  %3366 = vtanh.f32 %v2339_v21 }
 0x861   :  { %2483 = vst [vmem:[#allocation11 + $0x8] sm:$0xff] %v2449_v28 }
 0x862   :  { %2482 = vst [vmem:[#allocation11] sm:$0xff] %v2444_v22  ;;  %v2617_v39 = vpop.f32.mrb[18].mxu0 }
 0x863   :  { %v2459_v37 = vadd.f32 %v2617_v39, %v2555_v40  ;;  %v2453_v57 = vpop.f32.mrb[19].mxu0 }
 0x864   :  { %v2454_v60 = vadd.f32 %v2555_v40, %v2453_v57 }
 0x865   :  { %2485 = vst [vmem:[#allocation11 + $0x18] sm:$0xff] %v2459_v37 }
 0x866   :  { %2484 = vst [vmem:[#allocation11 + $0x10] sm:$0xff] %v2454_v60  ;;  %v2620_v18 = vpop.f32.mrb[20].mxu0 }
 0x867   :  { %v2469_v19 = vadd.f32 %v2620_v18, %v2555_v40  ;;  %v2463_v48 = vpop.f32.mrb[21].mxu0 }
 0x868   :  { %v2464_v54 = vadd.f32 %v2555_v40, %v2463_v48 }
 0x869   :  { %2487 = vst [vmem:[#allocation11 + $0x28] sm:$0xff] %v2469_v19 }
 0x86a   :  { %v3367_v7 = vpop.eup %3366  ;;  %2486 = vst [vmem:[#allocation11 + $0x20] sm:$0xff] %v2464_v54 }
 0x86b   :  { %v2341_v50 = vmul.f32 %v3367_v7, %v3365_v43 }
 0x86d   :  { %2622 = vmatmul.mubr.f32.gmra.mrb[22].mxu0 %v2341_v50 }
 0x940   :  { %v2623_v29 = vpop.f32.mrb[22].mxu0 }
 0x941   :  { %v2479_v2 = vadd.f32 %v2623_v29, %v2555_v40  ;;  %v2473_v8 = vpop.f32.mrb[23].mxu0 }
 0x942   :  { %v2474_v12 = vadd.f32 %v2555_v40, %v2473_v8 }
 0x943   :  { %2489 = vst [vmem:[#allocation11 + $0x38] sm:$0xff] %v2479_v2 }
 0x944   :  { %2488 = vst [vmem:[#allocation11 + $0x30] sm:$0xff] %v2474_v12 }
 0x945   :  { %3423 = shalt.err (!%p3420_p6)
}
 0x946   :  { %s3424_s29 = scalar_lea.hbm %s4089_s6, 1024 }
 0x947   :  { %p3425_p7 = scmp.ne.s32.totalorder %s4089_s6, %s3424_s29  ;;  %p3428_p8 = scmp.lt.u32.totalorder %s3424_s29, %s4089_s6 }
 0x949   :  { %p3430_p9 = pnand %p3428_p8, %p3425_p7 }
 0x94b   :  { %3433 = shalt.err (!%p3430_p9)
}
 0x94c   :  { %2501 = dma.vmem_to_hbm [thread:$0]  %s2496_s25, 1024, %s4089_s6, [#allocation8], %s3444_s3, %s3444_s3, %s3445_s21  }
 0x94d   :  { %3438 = dma.done.wait [#allocation8], 1024  }
 0x94e   :  { %3439 = vsyncadd [#allocation8], 4294966272 }
 0x94f   :  { %2505 = vsyncpa [#allocation7], 1 }
 0x950   :  { %2506 = vsyncpa [#allocation10], 1 }
 0x951   :  { %2507 = vsyncpa [#allocation8], 1 }

</bundles_post_ra>
